<compile_context>
chip_gen: v7x
topology: tpu7x:2x2x1
jax: 0.10.0
libtpu: 0.0.40
codegen_flags: <defaults>
</compile_context>

<pallas_src>
import functools
import re

import jax
import jax.numpy as jnp
from jax import lax
from jax.experimental import pallas as pl
from jax.experimental.pallas import tpu as pltpu


def _round_up(x, m):
    return ((x + m - 1) // m) * m


def _tpu_generation():
    """Best-effort TPU major generation (0 if unknown -> conservative path)."""
    try:
        kind = jax.devices()[0].device_kind
        m = re.search(r"(\d+)", kind)
        return int(m.group(1)) if m else 0
    except Exception:
        return 0


def _vmem_limit_bytes():
    """~75% of per-core VMEM (48 MiB on v7x, 96 MiB on v5e/v6e), capped."""
    try:
        cap = int(pltpu.get_tpu_info().vmem_capacity_bytes)
    except Exception:
        cap = 128 * 1024 * 1024
    return min(int(cap) * 3 // 4, 100 * 1024 * 1024)


def _pick_q_chunk(n, l, c, kp, va, exp_bytes, vmem_limit):
    """Largest query chunk (mult of 128, divides N) whose working set fits."""
    resident = n * (4 * c + 2 * kp + 2 * kp + 2 * va + 4 * va)   # cur,q,k,v,acc
    io = 2 * c * n * 4 + 2 * l * c * n * 4                        # in/out dbl-buf
    weights = 2 * l * ((c * kp + (kp + va) * c + c * c) * 2 + (va + 2 * c) * 4)
    fixed = resident + io + weights
    for tq in (1024, 512, 256, 128):
        per_chunk = tq * n * (4 + exp_bytes + 2 + 2)   # e(f32)+p+a(bf16)+slack
        if n % tq == 0 and fixed + per_chunk <= vmem_limit:
            return tq
    return 128


def _block_kernel(x_ref, wqt_ref, wkva_ref, bva_ref, wt_ref, shift_ref, o_ref,
                  cur_ref, q_ref, k_ref, v_ref, acc_ref,
                  *, num_layers, c_dim, kp, q_chunk, exp_dtype):
    C = c_dim
    N = cur_ref.shape[1]
    n_chunks = N // q_chunk

    cur_ref[...] = x_ref[0]                                   # (C, N) f32

    def layer_body(l, carry):
        x_f32 = cur_ref[...]
        x_bf = x_f32.astype(jnp.bfloat16)

        # Fused K / ones-augmented V projection: (Kp+VA, C) @ (C, N), f32 acc.
        kv = jnp.dot(wkva_ref[l], x_bf, preferred_element_type=jnp.float32)
        k_ref[...] = kv[:kp, :].astype(jnp.bfloat16)          # (Kp, N)
        v_ref[...] = (kv[kp:, :] + bva_ref[l]).astype(jnp.bfloat16)  # (VA, N)

        # q already transposed: (C, N)^T @ (C, Kp) -> (N, Kp) so the energy
        # matmul below is a natural (tq, Kp) @ (Kp, N) MXU contraction.
        q_ref[...] = lax.dot_general(
            x_bf, wqt_ref[l], (((0,), (0,)), ((), ())),
            preferred_element_type=jnp.float32).astype(jnp.bfloat16)

        acc_ref[...] = jnp.zeros_like(acc_ref)

        def chunk_body(ci, inner):
            s = pl.multiple_of(ci * q_chunk, q_chunk)
            qc = q_ref[pl.ds(s, q_chunk), :]                  # (tq, Kp) bf16
            e = jnp.dot(qc, k_ref[...],
                        preferred_element_type=jnp.float32)   # (tq, N) f32
            e = e - jnp.max(e, axis=-1, keepdims=True)
            p = jnp.exp(e.astype(exp_dtype))                  # bf16 exp on v6e+
            denom = jnp.sum(p, axis=-1, keepdims=True, dtype=jnp.float32)
            r = pl.reciprocal(denom, approx=True).astype(exp_dtype)
            a = (p * r).astype(jnp.bfloat16)                  # softmax rows
            # Rows [0:C) of the accumulator collect v @ A; the ones-row of the
            # augmented v collects col[m] = sum_q A[q, m] for free.
            acc_ref[...] += jnp.dot(v_ref[:, pl.ds(s, q_chunk)], a,
                                    preferred_element_type=jnp.float32)
            return inner

        lax.fori_loop(0, n_chunks, chunk_body, 0)

        acc = acc_ref[...]                                    # (VA, N) f32
        col = acc[C:C + 1, :]                                 # sum over queries
        # Offset-attention renormalisation A / (1e-9 + col), commuted onto x_r.
        x_r = acc[:C, :] * pl.reciprocal(1e-9 + col, approx=False)

        diff = (x_f32 - x_r).astype(jnp.bfloat16)             # V == C
        t = jnp.dot(wt_ref[l], diff,
                    preferred_element_type=jnp.float32)       # (C, N) f32
        t = jnp.maximum(t + shift_ref[l], 0.0)   # BN scale folded into Wt

        new = x_f32 + t                                       # residual
        cur_ref[...] = new
        o_ref[0, l, :, :] = new                               # concat slice l
        return carry

    lax.fori_loop(0, num_layers, layer_body, 0)


def pack_block_params(layer_params):
    """Stack per-layer params and pre-process for the fused kernel."""
    wq = jnp.stack([p[0] for p in layer_params])      # (L, K, C)
    wk = jnp.stack([p[1] for p in layer_params])      # (L, K, C)
    wv = jnp.stack([p[2] for p in layer_params])      # (L, V, C)
    bv = jnp.stack([p[3] for p in layer_params])      # (L, V, 1)
    wt = jnp.stack([p[4] for p in layer_params])      # (L, C, V)
    bt = jnp.stack([p[5] for p in layer_params])      # (L, C, 1)
    scale = jnp.stack([p[6] for p in layer_params])   # (L, C, 1)
    shift = jnp.stack([p[7] for p in layer_params])   # (L, C, 1)

    L, K, C = wq.shape
    V = wv.shape[1]
    Kp = max(128, _round_up(K, 128))      # lane-dense / MXU-depth-free key pad
    VA = V + 8                            # +1 ones-row (+7 zero rows, aligned)

    pad_k = [(0, 0), (0, Kp - K), (0, 0)]
    wq_p = jnp.pad(wq, pad_k)
    wk_p = jnp.pad(wk, pad_k)
    wv_a = jnp.pad(wv, [(0, 0), (0, VA - V), (0, 0)])
    ones_row = jnp.zeros((L, VA - V, 1), bv.dtype).at[:, 0, 0].set(1.0)
    bva = jnp.concatenate([bv, ones_row], axis=1)                    # (L, VA, 1)

    wqt = jnp.swapaxes(wq_p, 1, 2).astype(jnp.bfloat16)              # (L, C, Kp)
    wkva = jnp.concatenate([wk_p, wv_a], axis=1).astype(jnp.bfloat16)  # (L,Kp+VA,C)
    wt_s = (scale * wt).astype(jnp.bfloat16)     # BN scale folded into Wt
    shift_eff = scale * bt + shift               # conv bias folded into BN shift
    return wqt, wkva, bva, wt_s, shift_eff


def self_attention_block(x, packed_params, *, q_chunk=None, exp_dtype=None,
                         vmem_limit=None):
    """Self_Attention_Block.forward: L fused layers, outputs concat on dim=1."""
    wqt, wkva, bva, wt_s, shift = packed_params
    B, C, N = x.shape
    L, _, Kp = wqt.shape
    VA = bva.shape[1]
    assert VA - 8 == C, "residual path requires value_size == attention_features"
    assert C % 8 == 0, "attention_features must be a multiple of 8"
    assert N % 128 == 0, "N must be a multiple of 128 (pad + mask upstream)"

    if exp_dtype is None:
        # bf16 EUP exp only on v6e/v7x; keep f32 on v5e / unknown chips.
        exp_dtype = jnp.bfloat16 if _tpu_generation() >= 6 else jnp.float32
    if vmem_limit is None:
        vmem_limit = _vmem_limit_bytes()
    if q_chunk is None:
        q_chunk = _pick_q_chunk(N, L, C, Kp, VA,
                                jnp.dtype(exp_dtype).itemsize, vmem_limit)
    assert N % q_chunk == 0

    kernel = functools.partial(_block_kernel, num_layers=L, c_dim=C, kp=Kp,
                               q_chunk=q_chunk, exp_dtype=exp_dtype)

    def const3(shape):
        return pl.BlockSpec(shape, lambda b: (0, 0, 0))

    out = pl.pallas_call(
        kernel,
        out_shape=jax.ShapeDtypeStruct((B, L, C, N), jnp.float32),
        grid=(B,),
        in_specs=[
            pl.BlockSpec((1, C, N), lambda b: (b, 0, 0)),     # x
            const3(wqt.shape),                                # Wq^T       (bf16)
            const3(wkva.shape),                               # [Wk;Wv;1]  (bf16)
            const3(bva.shape),                                # bv (+ ones row)
            const3(wt_s.shape),                               # scale*Wt   (bf16)
            const3(shift.shape),                              # BN shift (+bt)
        ],
        out_specs=pl.BlockSpec((1, L, C, N), lambda b: (b, 0, 0, 0)),
        scratch_shapes=[
            pltpu.VMEM((C, N), jnp.float32),      # cur activation
            pltpu.VMEM((N, Kp), jnp.bfloat16),    # q (transposed)
            pltpu.VMEM((Kp, N), jnp.bfloat16),    # k
            pltpu.VMEM((VA, N), jnp.bfloat16),    # v (ones-augmented)
            pltpu.VMEM((VA, N), jnp.float32),     # x_r / col accumulator
        ],
        compiler_params=pltpu.CompilerParams(
            dimension_semantics=("parallel",),    # keep B even on v7x megacore
            vmem_limit_bytes=vmem_limit),
    )(x, wqt, wkva, bva, wt_s, shift)
    return out.reshape(B, L * C, N)               # == torch.cat(outputs, dim=1)


def init_layer_params(key, attention_features, key_size, value_size):
    kq, kk, kv, kbv, kt, kbt = jax.random.split(key, 6)
    C, K, V = attention_features, key_size, value_size
    s = 0.1
    wq = s * jax.random.normal(kq, (K, C), jnp.float32)
    wk = s * jax.random.normal(kk, (K, C), jnp.float32)
    wv = s * jax.random.normal(kv, (V, C), jnp.float32)
    bv = s * jax.random.normal(kbv, (V, 1), jnp.float32)
    wt = s * jax.random.normal(kt, (C, V), jnp.float32)
    bt = s * jax.random.normal(kbt, (C, 1), jnp.float32)
    # BatchNorm1d eval-mode fold: gamma=1, beta=0, running_mean=0, running_var=1
    eps = 1e-5
    scale = jnp.full((C, 1), 1.0 / jnp.sqrt(1.0 + eps), jnp.float32)
    shift = jnp.zeros((C, 1), jnp.float32)
    return (wq, wk, wv, bv, wt, bt, scale, shift)


# ---------------- pure-JAX f32 reference (for a sanity check) ----------------
def _layer_ref(x, params):
    wq, wk, wv, bv, wt, bt, scale, shift = params
    q = jnp.einsum('kc,bcn->bkn', wq, x)
    k = jnp.einsum('kc,bcn->bkn', wk, x)
    v = jnp.einsum('vc,bcn->bvn', wv, x) + bv[None]
    energy = jnp.einsum('bkn,bkm->bnm', q, k)
    attn = jax.nn.softmax(energy, axis=-1)
    attn = attn / (1e-9 + jnp.sum(attn, axis=1, keepdims=True))
    x_r = jnp.einsum('bvn,bnm->bvm', v, attn)
    t = jnp.einsum('cv,bvn->bcn', wt, x - x_r) + bt[None]
    t = jnp.maximum(t * scale[None] + shift[None], 0.0)
    return x + t


def _block_ref(x, layer_params):
    outs, prev = [], x
    for p in layer_params:
        prev = _layer_ref(prev, p)
        outs.append(prev)
    return jnp.concatenate(outs, axis=1)


if __name__ == "__main__":
    layers = 2
    attention_features = 32   # channels C
    key_size = 8
    value_size = 32           # must equal attention_features for the residual
    B, N = 2, 128             # B even (v7x megacore), N multiple of 128

    root = jax.random.PRNGKey(0)
    kx, *layer_keys = jax.random.split(root, 1 + layers)
    x = jax.random.normal(kx, (B, attention_features, N), jnp.float32)

    layer_params = [
        init_layer_params(k, attention_features, key_size, value_size)
        for k in layer_keys
    ]
    packed = pack_block_params(layer_params)

    out = self_attention_block(x, packed)
    out = jax.block_until_ready(out)

    assert out.shape == (B, layers * attention_features, N)
    ref = _block_ref(x, layer_params)
    # bf16 MXU operands + approx reciprocal + (v6e+) bf16 exp => relaxed tol.
    assert jnp.allclose(out, ref, atol=5e-2, rtol=5e-2), \
        float(jnp.max(jnp.abs(out - ref)))

    print("KERNEL_OK")
</pallas_src>

<mosaic_0001>
module attributes {stable_mosaic.version = 11 : i64} {
  func.func @_block_kernel(%arg0: i32, %arg1: memref<1x32x128xf32, #tpu.memory_space<vmem>>, %arg2: memref<2x32x128xbf16, #tpu.memory_space<vmem>>, %arg3: memref<2x168x32xbf16, #tpu.memory_space<vmem>>, %arg4: memref<2x40x1xf32, #tpu.memory_space<vmem>>, %arg5: memref<2x32x32xbf16, #tpu.memory_space<vmem>>, %arg6: memref<2x32x1xf32, #tpu.memory_space<vmem>>, %arg7: memref<1x2x32x128xf32, #tpu.memory_space<vmem>>, %arg8: memref<32x128xf32, #tpu.memory_space<vmem>>, %arg9: memref<128x128xbf16, #tpu.memory_space<vmem>>, %arg10: memref<128x128xbf16, #tpu.memory_space<vmem>>, %arg11: memref<40x128xbf16, #tpu.memory_space<vmem>>, %arg12: memref<40x128xf32, #tpu.memory_space<vmem>>) attributes {dimension_semantics = [#tpu.dimension_semantics<parallel>], iteration_bounds = array<i64: 2>, scalar_prefetch = 0 : i64, scratch_operands = 5 : i64, tpu.core_type = #tpu.core_type<tc>, window_params = [{transform_indices = @transform_0, window_bounds = array<i64: 1, 32, 128>}, {pipeline_mode = #tpu.pipeline_mode<synchronous>, transform_indices = @transform_1, window_bounds = array<i64: 2, 32, 128>}, {pipeline_mode = #tpu.pipeline_mode<synchronous>, transform_indices = @transform_2, window_bounds = array<i64: 2, 168, 32>}, {pipeline_mode = #tpu.pipeline_mode<synchronous>, transform_indices = @transform_3, window_bounds = array<i64: 2, 40, 1>}, {pipeline_mode = #tpu.pipeline_mode<synchronous>, transform_indices = @transform_4, window_bounds = array<i64: 2, 32, 32>}, {pipeline_mode = #tpu.pipeline_mode<synchronous>, transform_indices = @transform_5, window_bounds = array<i64: 2, 32, 1>}, {transform_indices = @transform_6, window_bounds = array<i64: 1, 2, 32, 128>}]} {
    %c0 = arith.constant 0 : index
    %c0_0 = arith.constant 0 : index
    %c0_1 = arith.constant 0 : index
    %0 = vector.load %arg1[%c0, %c0_0, %c0_1] : memref<1x32x128xf32, #tpu.memory_space<vmem>>, vector<1x32x128xf32>
    %1 = vector.shape_cast %0 : vector<1x32x128xf32> to vector<32x128xf32>
    %c0_2 = arith.constant 0 : index
    %c0_3 = arith.constant 0 : index
    %2 = vector.load %arg8[%c0_2, %c0_3] : memref<32x128xf32, #tpu.memory_space<vmem>>, vector<32x128xf32>
    tpu.vector_store %arg8[%c0_2, %c0_3], %1 {strides = array<i32>} : memref<32x128xf32, #tpu.memory_space<vmem>>, vector<32x128xf32>,
    %c0_i32 = arith.constant 0 : i32
    %c2_i32 = arith.constant 2 : i32
    %3 = arith.addi %c0_i32, %c2_i32 : i32
    %c1_i32 = arith.constant 1 : i32
    scf.for %arg13 = %c0_i32 to %3 step %c1_i32  : i32 {
      %c0_5 = arith.constant 0 : index
      %c0_6 = arith.constant 0 : index
      %4 = vector.load %arg8[%c0_5, %c0_6] : memref<32x128xf32, #tpu.memory_space<vmem>>, vector<32x128xf32>
      %5 = arith.truncf %4 : vector<32x128xf32> to vector<32x128xbf16>
      %6 = arith.index_cast %arg13 : i32 to index
      %c0_7 = arith.constant 0 : index
      %c0_8 = arith.constant 0 : index
      %7 = vector.load %arg3[%6, %c0_7, %c0_8] : memref<2x168x32xbf16, #tpu.memory_space<vmem>>, vector<1x168x32xbf16>
      %8 = vector.shape_cast %7 : vector<1x168x32xbf16> to vector<168x32xbf16>
      %cst = arith.constant dense<0.000000e+00> : vector<168x128xf32>
      %9 = tpu.matmul %8, %5, %cst {dimension_numbers = #tpu.dot_dimension_numbers<[1], [0], [0], [1], [0, 0, 1, 1], [], []>} : vector<168x32xbf16>, vector<32x128xbf16>, vector<168x128xf32> -> vector<168x128xf32>
      %10 = vector.extract_strided_slice %9 {offsets = [0, 0], sizes = [128, 128], strides = [1, 1]} : vector<168x128xf32> to vector<128x128xf32>
      %11 = arith.truncf %10 : vector<128x128xf32> to vector<128x128xbf16>
      %c0_9 = arith.constant 0 : index
      %c0_10 = arith.constant 0 : index
      %12 = vector.load %arg10[%c0_9, %c0_10] : memref<128x128xbf16, #tpu.memory_space<vmem>>, vector<128x128xbf16>
      tpu.vector_store %arg10[%c0_9, %c0_10], %11 {strides = array<i32>} : memref<128x128xbf16, #tpu.memory_space<vmem>>, vector<128x128xbf16>,
      %13 = vector.extract_strided_slice %9 {offsets = [128, 0], sizes = [40, 128], strides = [1, 1]} : vector<168x128xf32> to vector<40x128xf32>
      %14 = arith.index_cast %arg13 : i32 to index
      %c0_11 = arith.constant 0 : index
      %c0_12 = arith.constant 0 : index
      %15 = vector.load %arg4[%14, %c0_11, %c0_12] : memref<2x40x1xf32, #tpu.memory_space<vmem>>, vector<1x40x1xf32>
      %16 = vector.shape_cast %15 : vector<1x40x1xf32> to vector<40x1xf32>
      %17 = vector.broadcast %16 : vector<40x1xf32> to vector<40x128xf32>
      %18 = arith.addf %13, %17 : vector<40x128xf32>
      %19 = arith.truncf %18 : vector<40x128xf32> to vector<40x128xbf16>
      %c0_13 = arith.constant 0 : index
      %c0_14 = arith.constant 0 : index
      %20 = vector.load %arg11[%c0_13, %c0_14] : memref<40x128xbf16, #tpu.memory_space<vmem>>, vector<40x128xbf16>
      tpu.vector_store %arg11[%c0_13, %c0_14], %19 {strides = array<i32>} : memref<40x128xbf16, #tpu.memory_space<vmem>>, vector<40x128xbf16>,
      %21 = arith.index_cast %arg13 : i32 to index
      %c0_15 = arith.constant 0 : index
      %c0_16 = arith.constant 0 : index
      %22 = vector.load %arg2[%21, %c0_15, %c0_16] : memref<2x32x128xbf16, #tpu.memory_space<vmem>>, vector<1x32x128xbf16>
      %23 = vector.shape_cast %22 : vector<1x32x128xbf16> to vector<32x128xbf16>
      %cst_17 = arith.constant dense<0.000000e+00> : vector<128x128xf32>
      %24 = tpu.matmul %5, %23, %cst_17 {dimension_numbers = #tpu.dot_dimension_numbers<[0], [0], [1], [1], [0, 1, 1, 1], [], []>} : vector<32x128xbf16>, vector<32x128xbf16>, vector<128x128xf32> -> vector<128x128xf32>
      %25 = arith.truncf %24 : vector<128x128xf32> to vector<128x128xbf16>
      %c0_18 = arith.constant 0 : index
      %c0_19 = arith.constant 0 : index
      %26 = vector.load %arg9[%c0_18, %c0_19] : memref<128x128xbf16, #tpu.memory_space<vmem>>, vector<128x128xbf16>
      tpu.vector_store %arg9[%c0_18, %c0_19], %25 {strides = array<i32>} : memref<128x128xbf16, #tpu.memory_space<vmem>>, vector<128x128xbf16>,
      %cst_20 = arith.constant 0.000000e+00 : f32
      %27 = vector.broadcast %cst_20 : f32 to vector<40x128xf32>
      %c0_21 = arith.constant 0 : index
      %c0_22 = arith.constant 0 : index
      %28 = vector.load %arg12[%c0_21, %c0_22] : memref<40x128xf32, #tpu.memory_space<vmem>>, vector<40x128xf32>
      tpu.vector_store %arg12[%c0_21, %c0_22], %27 {strides = array<i32>} : memref<40x128xf32, #tpu.memory_space<vmem>>, vector<40x128xf32>,
      %c0_i32_23 = arith.constant 0 : i32
      %c128_i32 = arith.constant 128 : i32
      %29 = arith.muli %c0_i32_23, %c128_i32 : i32
      %30 = tpu.assume_multiple %29, 128 : i32
      %31 = arith.index_cast %30 : i32 to index
      %c0_24 = arith.constant 0 : index
      %32 = vector.load %arg9[%31, %c0_24] : memref<128x128xbf16, #tpu.memory_space<vmem>>, vector<128x128xbf16>
      %c0_25 = arith.constant 0 : index
      %c0_26 = arith.constant 0 : index
      %33 = vector.load %arg10[%c0_25, %c0_26] : memref<128x128xbf16, #tpu.memory_space<vmem>>, vector<128x128xbf16>
      %cst_27 = arith.constant dense<0.000000e+00> : vector<128x128xf32>
      %34 = tpu.matmul %32, %33, %cst_27 {dimension_numbers = #tpu.dot_dimension_numbers<[1], [0], [0], [1], [0, 0, 1, 1], [], []>} : vector<128x128xbf16>, vector<128x128xbf16>, vector<128x128xf32> -> vector<128x128xf32>
      %cst_28 = arith.constant dense<0xFF800000> : vector<128xf32>
      %35 = vector.multi_reduction <maximumf>, %34, %cst_28 [1] : vector<128x128xf32> to vector<128xf32>
      %36 = vector.shape_cast %35 : vector<128xf32> to vector<128x1xf32>
      %37 = vector.broadcast %36 : vector<128x1xf32> to vector<128x128xf32>
      %38 = arith.subf %34, %37 : vector<128x128xf32>
      %39 = math.exp %38 : vector<128x128xf32>
      %cst_29 = arith.constant dense<0.000000e+00> : vector<128xf32>
      %40 = vector.multi_reduction <add>, %39, %cst_29 [1] : vector<128x128xf32> to vector<128xf32>
      %41 = vector.shape_cast %40 : vector<128xf32> to vector<128x1xf32>
      %42 = tpu.reciprocal %41 {approx = true} : vector<128x1xf32> -> vector<128x1xf32>
      %43 = vector.broadcast %42 : vector<128x1xf32> to vector<128x128xf32>
      %44 = arith.mulf %39, %43 : vector<128x128xf32>
      %45 = arith.truncf %44 : vector<128x128xf32> to vector<128x128xbf16>
      %c0_30 = arith.constant 0 : index
      %c0_31 = arith.constant 0 : index
      %46 = vector.load %arg12[%c0_30, %c0_31] : memref<40x128xf32, #tpu.memory_space<vmem>>, vector<40x128xf32>
      %c0_32 = arith.constant 0 : index
      %47 = arith.index_cast %30 : i32 to index
      %48 = vector.load %arg11[%c0_32, %47] : memref<40x128xbf16, #tpu.memory_space<vmem>>, vector<40x128xbf16>
      %cst_33 = arith.constant dense<0.000000e+00> : vector<40x128xf32>
      %49 = tpu.matmul %48, %45, %cst_33 {dimension_numbers = #tpu.dot_dimension_numbers<[1], [0], [0], [1], [0, 0, 1, 1], [], []>} : vector<40x128xbf16>, vector<128x128xbf16>, vector<40x128xf32> -> vector<40x128xf32>
      %50 = arith.addf %46, %49 : vector<40x128xf32>
      %c0_34 = arith.constant 0 : index
      %c0_35 = arith.constant 0 : index
      %51 = vector.load %arg12[%c0_34, %c0_35] : memref<40x128xf32, #tpu.memory_space<vmem>>, vector<40x128xf32>
      tpu.vector_store %arg12[%c0_34, %c0_35], %50 {strides = array<i32>} : memref<40x128xf32, #tpu.memory_space<vmem>>, vector<40x128xf32>,
      %c1_i32_36 = arith.constant 1 : i32
      %c0_37 = arith.constant 0 : index
      %c0_38 = arith.constant 0 : index
      %52 = vector.load %arg12[%c0_37, %c0_38] : memref<40x128xf32, #tpu.memory_space<vmem>>, vector<40x128xf32>
      %53 = vector.extract_strided_slice %52 {offsets = [32, 0], sizes = [1, 128], strides = [1, 1]} : vector<40x128xf32> to vector<1x128xf32>
      %54 = vector.extract_strided_slice %52 {offsets = [0, 0], sizes = [32, 128], strides = [1, 1]} : vector<40x128xf32> to vector<32x128xf32>
      %cst_39 = arith.constant 9.99999971E-10 : f32
      %55 = vector.broadcast %cst_39 : f32 to vector<1x128xf32>
      %56 = arith.addf %55, %53 : vector<1x128xf32>
      %57 = tpu.reciprocal %56 : vector<1x128xf32> -> vector<1x128xf32>
      %58 = vector.broadcast %57 : vector<1x128xf32> to vector<32x128xf32>
      %59 = arith.mulf %54, %58 : vector<32x128xf32>
      %60 = arith.subf %4, %59 : vector<32x128xf32>
      %61 = arith.truncf %60 : vector<32x128xf32> to vector<32x128xbf16>
      %62 = arith.index_cast %arg13 : i32 to index
      %c0_40 = arith.constant 0 : index
      %c0_41 = arith.constant 0 : index
      %63 = vector.load %arg5[%62, %c0_40, %c0_41] : memref<2x32x32xbf16, #tpu.memory_space<vmem>>, vector<1x32x32xbf16>
      %64 = vector.shape_cast %63 : vector<1x32x32xbf16> to vector<32x32xbf16>
      %cst_42 = arith.constant dense<0.000000e+00> : vector<32x128xf32>
      %65 = tpu.matmul %64, %61, %cst_42 {dimension_numbers = #tpu.dot_dimension_numbers<[1], [0], [0], [1], [0, 0, 1, 1], [], []>} : vector<32x32xbf16>, vector<32x128xbf16>, vector<32x128xf32> -> vector<32x128xf32>
      %66 = arith.index_cast %arg13 : i32 to index
      %c0_43 = arith.constant 0 : index
      %c0_44 = arith.constant 0 : index
      %67 = vector.load %arg6[%66, %c0_43, %c0_44] : memref<2x32x1xf32, #tpu.memory_space<vmem>>, vector<1x32x1xf32>
      %68 = vector.shape_cast %67 : vector<1x32x1xf32> to vector<32x1xf32>
      %69 = vector.broadcast %68 : vector<32x1xf32> to vector<32x128xf32>
      %70 = arith.addf %65, %69 : vector<32x128xf32>
      %cst_45 = arith.constant 0.000000e+00 : f32
      %71 = vector.broadcast %cst_45 : f32 to vector<32x128xf32>
      %72 = arith.maximumf %70, %71 : vector<32x128xf32>
      %73 = arith.addf %4, %72 : vector<32x128xf32>
      %c0_46 = arith.constant 0 : index
      %c0_47 = arith.constant 0 : index
      %74 = vector.load %arg8[%c0_46, %c0_47] : memref<32x128xf32, #tpu.memory_space<vmem>>, vector<32x128xf32>
      tpu.vector_store %arg8[%c0_46, %c0_47], %73 {strides = array<i32>} : memref<32x128xf32, #tpu.memory_space<vmem>>, vector<32x128xf32>,
      %c0_48 = arith.constant 0 : index
      %75 = arith.index_cast %arg13 : i32 to index
      %c0_49 = arith.constant 0 : index
      %c0_50 = arith.constant 0 : index
      %76 = vector.load %arg7[%c0_48, %75, %c0_49, %c0_50] : memref<1x2x32x128xf32, #tpu.memory_space<vmem>>, vector<1x1x32x128xf32>
      %77 = vector.shape_cast %76 : vector<1x1x32x128xf32> to vector<32x128xf32>
      %78 = vector.shape_cast %73 : vector<32x128xf32> to vector<1x1x32x128xf32>
      tpu.vector_store %arg7[%c0_48, %75, %c0_49, %c0_50], %78 {strides = array<i32>} : memref<1x2x32x128xf32, #tpu.memory_space<vmem>>, vector<1x1x32x128xf32>,
    }
    %c2_i32_4 = arith.constant 2 : i32
    return
  }
  func.func @transform_0(%arg0: i32) -> (i32, i32, i32) {
    %c0_i32 = arith.constant 0 : i32
    %c0_i32_0 = arith.constant 0 : i32
    %c0_i32_1 = arith.constant 0 : i32
    return %arg0, %c0_i32, %c0_i32_0 : i32, i32, i32
  }
  func.func @transform_1(%arg0: i32) -> (i32, i32, i32) {
    %c0_i32 = arith.constant 0 : i32
    %c0_i32_0 = arith.constant 0 : i32
    %c0_i32_1 = arith.constant 0 : i32
    %c0_i32_2 = arith.constant 0 : i32
    return %c0_i32, %c0_i32_0, %c0_i32_1 : i32, i32, i32
  }
  func.func @transform_2(%arg0: i32) -> (i32, i32, i32) {
    %c0_i32 = arith.constant 0 : i32
    %c0_i32_0 = arith.constant 0 : i32
    %c0_i32_1 = arith.constant 0 : i32
    %c0_i32_2 = arith.constant 0 : i32
    return %c0_i32, %c0_i32_0, %c0_i32_1 : i32, i32, i32
  }
  func.func @transform_3(%arg0: i32) -> (i32, i32, i32) {
    %c0_i32 = arith.constant 0 : i32
    %c0_i32_0 = arith.constant 0 : i32
    %c0_i32_1 = arith.constant 0 : i32
    %c0_i32_2 = arith.constant 0 : i32
    return %c0_i32, %c0_i32_0, %c0_i32_1 : i32, i32, i32
  }
  func.func @transform_4(%arg0: i32) -> (i32, i32, i32) {
    %c0_i32 = arith.constant 0 : i32
    %c0_i32_0 = arith.constant 0 : i32
    %c0_i32_1 = arith.constant 0 : i32
    %c0_i32_2 = arith.constant 0 : i32
    return %c0_i32, %c0_i32_0, %c0_i32_1 : i32, i32, i32
  }
  func.func @transform_5(%arg0: i32) -> (i32, i32, i32) {
    %c0_i32 = arith.constant 0 : i32
    %c0_i32_0 = arith.constant 0 : i32
    %c0_i32_1 = arith.constant 0 : i32
    %c0_i32_2 = arith.constant 0 : i32
    return %c0_i32, %c0_i32_0, %c0_i32_1 : i32, i32, i32
  }
  func.func @transform_6(%arg0: i32) -> (i32, i32, i32, i32) {
    %c0_i32 = arith.constant 0 : i32
    %c0_i32_0 = arith.constant 0 : i32
    %c0_i32_1 = arith.constant 0 : i32
    %c0_i32_2 = arith.constant 0 : i32
    return %arg0, %c0_i32, %c0_i32_0, %c0_i32_1 : i32, i32, i32, i32
  }
}

</mosaic_0001>

<bundles_post_ra>
// kernel: tpu_custom_call.1
= control target key start
LH: loop header
LB: loop body
LE: loop exit
PB: predicated region body
PF: predicated region fallthrough
CT: control target
= control target key end

     0   :  { %11 = vsyncpa [#allocation8], 0  ;;  %s2849_s0 = inlined_call_operand.hbm [shape: f32[2,32,128], index: 0, kind: input, shape index: {}]   ;;  %s2850_s1 = inlined_call_operand.hbm [shape: bf16[2,32,128], index: 1, kind: input, shape index: {}]   ;;  %s2851_s2 = inlined_call_operand.hbm [shape: bf16[2,168,32], index: 2, kind: input, shape index: {}]   ;;  %s2852_s3 = inlined_call_operand.hbm [shape: f32[2,40,1], index: 3, kind: input, shape index: {}]   ;;  %s2853_s4 = inlined_call_operand.hbm [shape: bf16[2,32,32], index: 4, kind: input, shape index: {}]   ;;  %s2854_s5 = inlined_call_operand.hbm [shape: f32[2,32,1], index: 5, kind: input, shape index: {}]   ;;  %s2855_s6 = inlined_call_operand.hbm [shape: f32[2,2,32,128], index: 6, kind: output, shape index: {}]  }
   0x1   :  { %13 = vsyncpa [#allocation8 + $0x1], 0 }
   0x2   :  { %14 = vsyncpa [#allocation11], 0 }
   0x3   :  { %15 = vsyncpa [#allocation14], 0 }
   0x4   :  { %16 = vsyncpa [#allocation17], 0 }
   0x5   :  { %17 = vsyncpa [#allocation9], 0 }
   0x6   :  { %19 = vsyncpa [#allocation9 + $0x1], 0  ;;  %s2292_s21 = smov 0   ;;  %s2294_s22 = smov 0  }
   0x7   :  { %s2296_s23 = smov 0   ;;  %s2298_s24 = smov 0  }
   0x8 LB: > { %s2241_s25 = smov [#allocation10]   ;;  %s2313_s27 = sadd.s32 4294967295, %s2235_s24   ;;  %s2235_s24 = sphi %s2298_s24, %s2883_s24   ;;  %s2231_s23 = sphi %s2296_s23, %s2882_s23   ;;  %s2227_s22 = sphi %s2294_s22, %s2881_s22   ;;  %s2223_s21 = sphi %s2292_s21, %s2880_s21  }
   0x9   : > { %s199_s26 = sshll.u32 %s2241_s25, 4  ;;  %p1496_p0 = scmp.ge.s32.totalorder %s2235_s24, 1  ;;  %s2318_s26 = int_to_ptr.vmem [resolvable:$true] %s199_s26 }
   0xa   : > { %p2856_p1 = scmp.eq.s32.totalorder %s2313_s27, 0  ;;  %p187_p2 = scmp.lt.s32.totalorder %s2235_s24, 3 }
   0xb   : > { %s2242_s29 = smov [#allocation13]   ;;  %s2243_s8 = smov [#allocation12]  }
   0xc   : > { %p2320_p3 = pnand %p1496_p0, %p187_p2  ;;  %s225_s30 = sshll.u32 %s2242_s29, 4  ;;  %s2333_s30 = int_to_ptr.vmem [resolvable:$true] %s225_s30 }
   0xd   : > { %s2335_s9 = sshll.u32 %s2243_s8, 4  ;;  %s1983_s12 = scalar_lea.hbm %s2850_s1, 512  ;;  %s213_s9 = int_to_ptr.vmem [resolvable:$true] %s2335_s9 }
   0xe   : > { %s2861_s28 = scalar_select %p2320_p3, 1, 0 }
   0xf   : > { %p1803_p5 = pneg %p2320_p3  ;;  %p1984_p7 = scmp.ne.s32.totalorder %s2850_s1, %s1983_s12 }
  0x10   : > { %p1990_p11 = scmp.lt.u32.totalorder %s1983_s12, %s2850_s1 }
  0x11   : > { %p2329_p6 = pnand %p1803_p5, %p2856_p1 }
  0x13   : > { %p2345_p8 = pneg %p2329_p6 }
  0x15   : > { %p1986_p9 = pnand %p2345_p8, %p1984_p7 }
  0x17   : > { %p1987_p10 = pneg %p1986_p9 }
  0x19   : > { %p1992_p12 = pnand %p1990_p11, %p1987_p10 }
  0x1b   : > { %1995 = shalt.err (!%p1992_p12)
}
  0x1c   : > { %s1996_s18 = scalar_lea.vmem %s2318_s26, 512  ;;  %p2004_p5 = scmp.lt.s32.totalorder %s2318_s26, %s2318_s26 }
  0x1d   : > { %p1997_p13 = scmp.ne.s32.totalorder %s2318_s26, %s1996_s18  ;;  %p2005_p4 = scmp.lt.s32.totalorder %s1996_s18, %s1996_s18 }
  0x1f   : > { %p1999_p0 = pnand %p1997_p13, %p2345_p8  ;;  %p2006_p7 = por %p2005_p4, %p2004_p5 }
  0x21   : > { %p2000_p2 = pneg %p1999_p0 }
  0x23   : > { %p2007_p9 = pnand %p2006_p7, %p2000_p2 }
  0x25   : > { %2010 = shalt.err (!%p2007_p9)
}
  0x26   : > { %s2244_s19 = smov 64   ;;  %s2245_s20 = smov 4  }
  0x27   : > { %1806 = dma.hbm_to_vmem [thread:$0]  (!%p2329_p6), %s2850_s1, 512, %s2318_s26, [#allocation11], %s2244_s19, %s2244_s19, %s2245_s20  }
  0x28   : > { %s2011_s11 = scalar_lea.hbm %s2852_s3, 1280 }
  0x29   : > { %p2012_p4 = scmp.ne.s32.totalorder %s2852_s3, %s2011_s11  ;;  %p2018_p12 = scmp.lt.u32.totalorder %s2011_s11, %s2852_s3 }
  0x2b   : > { %p2014_p10 = pnand %p2012_p4, %p2345_p8 }
  0x2d   : > { %p2015_p11 = pneg %p2014_p10 }
  0x2f   : > { %p2020_p13 = pnand %p2018_p12, %p2015_p11 }
  0x31   : > { %2023 = shalt.err (!%p2020_p13)
}
  0x32   : > { %s2024_s26 = scalar_lea.vmem %s2333_s30, 1280  ;;  %p2032_p7 = scmp.lt.s32.totalorder %s2333_s30, %s2333_s30 }
  0x33   : > { %p2025_p0 = scmp.ne.s32.totalorder %s2333_s30, %s2024_s26  ;;  %p2033_p9 = scmp.lt.s32.totalorder %s2024_s26, %s2024_s26 }
  0x35   : > { %p2027_p2 = pnand %p2025_p0, %p2345_p8  ;;  %p2034_p4 = por %p2033_p9, %p2032_p7 }
  0x37   : > { %p2028_p5 = pneg %p2027_p2 }
  0x39   : > { %p2035_p10 = pnand %p2034_p4, %p2028_p5 }
  0x3b   : > { %2038 = shalt.err (!%p2035_p10)
}
  0x3c   : > { %s2858_s17 = smov 128   ;;  %s2247_s18 = smov 8  }
  0x3d   : > { %1812 = dma.hbm_to_vmem [thread:$0]  (!%p2329_p6), %s2852_s3, 1280, %s2333_s30, [#allocation14], %s2858_s17, %s2858_s17, %s2247_s18  }
  0x3e   : > { %s2039_s11 = scalar_lea.hbm %s2851_s2, 2688 }
  0x3f   : > { %p2040_p11 = scmp.ne.s32.totalorder %s2851_s2, %s2039_s11  ;;  %p2046_p0 = scmp.lt.u32.totalorder %s2039_s11, %s2851_s2 }
  0x41   : > { %p2042_p12 = pnand %p2040_p11, %p2345_p8 }
  0x43   : > { %p2043_p13 = pneg %p2042_p12 }
  0x45   : > { %p2048_p2 = pnand %p2046_p0, %p2043_p13 }
  0x47   : > { %2051 = shalt.err (!%p2048_p2)
}
  0x48   : > { %s2052_s26 = scalar_lea.vmem %s213_s9, 2688  ;;  %p2060_p4 = scmp.lt.s32.totalorder %s213_s9, %s213_s9 }
  0x49   : > { %p2053_p5 = scmp.ne.s32.totalorder %s213_s9, %s2052_s26  ;;  %p2061_p10 = scmp.lt.s32.totalorder %s2052_s26, %s2052_s26 }
  0x4b   : > { %p2055_p7 = pnand %p2053_p5, %p2345_p8  ;;  %p2062_p1 = por %p2061_p10, %p2060_p4 }
  0x4d   : > { %p2056_p9 = pneg %p2055_p7 }
  0x4f   : > { %p2063_p3 = pnand %p2062_p1, %p2056_p9 }
  0x51   : > { %2066 = shalt.err (!%p2063_p3)
}
  0x52   : > { %1809 = dma.hbm_to_vmem [thread:$0]  (!%p2329_p6), %s2851_s2, 2688, %s213_s9, [#allocation11], %s2244_s19, %s2244_s19, %s2245_s20  }
  0x53   : > { %s2248_s29 = smov [#allocation15]   ;;  %s2249_s10 = smov [#allocation16]  }
  0x54   : > { %s238_s8 = sshll.u32 %s2248_s29, 4  ;;  %s251_s11 = sshll.u32 %s2249_s10, 4  ;;  %s239_s8 = int_to_ptr.vmem [resolvable:$true] %s238_s8  ;;  %s252_s11 = int_to_ptr.vmem [resolvable:$true] %s251_s11 }
  0x55   : > { %s2067_s14 = scalar_lea.hbm %s2853_s4, 512 }
  0x56   : > { %p2068_p1 = scmp.ne.s32.totalorder %s2853_s4, %s2067_s14  ;;  %p2074_p12 = scmp.lt.u32.totalorder %s2067_s14, %s2853_s4 }
  0x58   : > { %p2070_p3 = pnand %p2068_p1, %p2345_p8 }
  0x5a   : > { %p2071_p11 = pneg %p2070_p3 }
  0x5c   : > { %p2076_p13 = pnand %p2074_p12, %p2071_p11 }
  0x5e   : > { %2079 = shalt.err (!%p2076_p13)
}
  0x5f   : > { %s2080_s9 = scalar_lea.vmem %s239_s8, 512  ;;  %p2088_p7 = scmp.lt.s32.totalorder %s239_s8, %s239_s8 }
  0x60   : > { %p2081_p0 = scmp.ne.s32.totalorder %s239_s8, %s2080_s9  ;;  %p2089_p9 = scmp.lt.s32.totalorder %s2080_s9, %s2080_s9 }
  0x62   : > { %p2083_p2 = pnand %p2081_p0, %p2345_p8  ;;  %p2090_p4 = por %p2089_p9, %p2088_p7 }
  0x64   : > { %p2084_p5 = pneg %p2083_p2 }
  0x66   : > { %p2091_p10 = pnand %p2090_p4, %p2084_p5 }
  0x68   : > { %2094 = shalt.err (!%p2091_p10)
}
  0x69   : > { %1815 = dma.hbm_to_vmem [thread:$0]  (!%p2329_p6), %s2853_s4, 512, %s239_s8, [#allocation14], %s2244_s19, %s2244_s19, %s2245_s20  }
  0x6a   : > { %s2095_s12 = scalar_lea.hbm %s2854_s5, 1024 }
  0x6b   : > { %p2096_p1 = scmp.ne.s32.totalorder %s2854_s5, %s2095_s12  ;;  %p2102_p12 = scmp.lt.u32.totalorder %s2095_s12, %s2854_s5 }
  0x6d   : > { %p2098_p3 = pnand %p2096_p1, %p2345_p8 }
  0x6f   : > { %p2099_p11 = pneg %p2098_p3 }
  0x71   : > { %p2104_p13 = pnand %p2102_p12, %p2099_p11 }
  0x73   : > { %2107 = shalt.err (!%p2104_p13)
}
  0x74   : > { %s2108_s30 = scalar_lea.vmem %s252_s11, 1024  ;;  %p2116_p7 = scmp.lt.s32.totalorder %s252_s11, %s252_s11 }
  0x75   : > { %p2109_p0 = scmp.ne.s32.totalorder %s252_s11, %s2108_s30  ;;  %p2117_p9 = scmp.lt.s32.totalorder %s2108_s30, %s2108_s30 }
  0x77   : > { %p2111_p2 = pnand %p2109_p0, %p2345_p8  ;;  %p2118_p4 = por %p2117_p9, %p2116_p7 }
  0x79   : > { %p2112_p5 = pneg %p2111_p2 }
  0x7b   : > { %p2119_p10 = pnand %p2118_p4, %p2112_p5 }
  0x7d   : > { %2122 = shalt.err (!%p2119_p10)
}
  0x7e   : > { %s2864_s19 = smov 128   ;;  %s1495_s7 = sadd.s32 4294967294, %s2235_s24  }
  0x7f   : > { %1818 = dma.hbm_to_vmem [thread:$0]  (!%p2329_p6), %s2854_s5, 1024, %s252_s11, [#allocation17], %s2864_s19, %s2864_s19, %s2247_s18  }
  0x80   : > { %s2461_s15 = sadd.s32 1, %s2235_s24   ;;  %s32_s9 = sadd.s32 1, %s2231_s23 }
  0x81   : > { %s29_s17 = ssub.s32 %s2235_s24, %s2461_s15  ;;  %p39_p8 = scmp.ne.s32.totalorder %s2231_s23, %s2227_s22 }
  0x82   : > { %p30_p1 = scmp.eq.s32.totalorder %s29_s17, 0  ;;  %p40_p3 = scmp.eq.s32.totalorder %s2235_s24, 0 }
  0x83   : > { %p45_p11 = scmp.ne.s32.totalorder %s2227_s22, %s2223_s21  ;;  %p174_p12 = scmp.eq.s32.totalorder %s2313_s27, 1 }
  0x84   : > { %s2473_s25 = scalar_select %p30_p1, %s2231_s23, %s32_s9  }
  0x85   : > { %p41_p13 = por %p40_p3, %p39_p8  ;;  %p2865_p0 = scmp.eq.s32.totalorder %s2313_s27, 0 }
  0x86   : > { %p2481_p6 = por %p174_p12, %p39_p8  ;;  %p180_p5 = scmp.eq.s32.totalorder %s1495_s7, 1 }
  0x87   : > { %p2477_p2 = por %p2865_p0, %p45_p11  ;;  %p1832_p7 = scmp.lt.s32.totalorder %s2235_s24, 2 }
  0x88   : > { %s2867_s11 = scalar_select %p2481_p6, 1, 0 }
  0x89   : > { %s265_s10 = sand.u32 1, %s2231_s23   ;;  %p2487_p9 = por %p180_p5, %p45_p11 }
  0x8a   : > { %s1503_s13 = sshll.u32 %s265_s10, 5  ;;  %s1568_s14 = sshll.u32 %s2235_s24, 9 }
  0x8b   : > { %s2868_s12 = scalar_select %p2487_p9, 1, 0 }
  0x8c   : > { %s2495_s30 = scalar_lea.hbm %s2849_s0, %s1568_s14  ;;  %s269_s20 = scalar_lea.vmem [#allocation7], %s1503_s13 }
  0x8d   : > { %s276_s8 = sshll.u32 %s269_s20, 4  ;;  %p2497_p4 = pnand %p1832_p7, %p41_p13  ;;  %s2501_s8 = int_to_ptr.vmem [resolvable:$true] %s276_s8 }
  0x8e   : > { %s2503_s9 = scalar_lea.sflag [#allocation8], %s265_s10  ;;  %s2123_s17 = scalar_lea.hbm %s2495_s30, 512 }
  0x8f   : > { %p2124_p10 = scmp.ne.s32.totalorder %s2495_s30, %s2123_s17  ;;  %p2125_p8 = pneg %p2497_p4 }
  0x90   : > { %s2128_s16 = scalar_lea.hbm %s2849_s0, 1024  ;;  %p2129_p11 = scmp.lt.u32.totalorder %s2495_s30, %s2849_s0 }
  0x91   : > { %p2126_p1 = pnand %p2125_p8, %p2124_p10  ;;  %p2130_p12 = scmp.lt.u32.totalorder %s2128_s16, %s2123_s17 }
  0x92   : > { %p2132_p0 = scmp.lt.u32.totalorder %s2123_s17, %s2495_s30 }
  0x93   : > { %p2127_p3 = pneg %p2126_p1  ;;  %p2131_p13 = por %p2130_p12, %p2129_p11 }
  0x95   : > { %p2133_p5 = por %p2132_p0, %p2131_p13 }
  0x97   : > { %p2134_p7 = pnand %p2133_p5, %p2127_p3 }
  0x99   : > { %2137 = shalt.err (!%p2134_p7)
}
  0x9a   : > { %s2138_s10 = scalar_lea.vmem %s2501_s8, 512  ;;  %s2250_s13 = smov [#allocation7]  }
  0x9b   : > { %p2139_p10 = scmp.ne.s32.totalorder %s2501_s8, %s2138_s10  ;;  %s2143_s14 = sshll.u32 %s2250_s13, 4  ;;  %s2144_s14 = int_to_ptr.vmem [resolvable:$false] %s2143_s14 }
  0x9c   : > { %s2145_s26 = scalar_lea.vmem %s2144_s14, 1024  ;;  %p2146_p6 = scmp.lt.s32.totalorder %s2501_s8, %s2144_s14 }
  0x9d   : > { %p2141_p1 = pnand %p2139_p10, %p2125_p8  ;;  %p2147_p11 = scmp.lt.s32.totalorder %s2145_s26, %s2138_s10 }
  0x9f   : > { %p2142_p9 = pneg %p2141_p1  ;;  %p2148_p12 = por %p2147_p11, %p2146_p6 }
  0xa1   : > { %p2149_p13 = pnand %p2148_p12, %p2142_p9 }
  0xa3   : > { %2152 = shalt.err (!%p2149_p13)
}
  0xa4   : > { %1822 = dma.hbm_to_vmem [thread:$0]  (!%p2497_p4), %s2495_s30, 512, %s2501_s8, %s2503_s9, %s2864_s19, %s2864_s19, %s2247_s18  }
  0xa5   : > { %p2870_p8 = scmp.ne.s32.totalorder %s2861_s28, 0 }
  0xa6   : > { %s2537_s17 = sand.u32 (!%p2870_p8), 1, %s2227_s22  }
  0xa7   : > { %288 = sbr.rel (%p2870_p8) target bundleno = 1598 (0x63e), region = 44  ;;  %s1507_s16 = sshll.u32 (!%p2870_p8), %s2537_s17, 5 }
  0xa8   : > { %s291_s20 = scalar_lea.sflag (!%p2870_p8), [#allocation8], %s2537_s17  ;;  %s294_s10 = scalar_lea.vmem (!%p2870_p8), [#allocation7], %s1507_s16 }
  0xae   : > { %2202 = dma.done.wait (%p2477_p2), %s291_s20, 512  }
  0xaf   : > { %2204 = vsyncadd (%p2477_p2), %s291_s20, 4294966784  ;;  %p2871_p6 = scmp.eq.s32.totalorder %s2313_s27, 0 }
  0xb1   : > { %2206 = dma.done.wait (%p2871_p6), [#allocation11], 3200   ;;  %p2872_p9 = pmov %p2871_p6 }
  0xb2   : > { %p2873_p4 = pmov %p2871_p6 }
  0xb3   : > { %2208 = vsyncadd (%p2872_p9), [#allocation11], 4294964096 }
  0xb4   : > { %2210 = dma.done.wait (%p2873_p4), [#allocation14], 1792   ;;  %p2874_p3 = pmov %p2873_p4 }
  0xb6   : > { %2212 = vsyncadd (%p2874_p3), [#allocation14], 4294965504  ;;  %p2875_p0 = pmov %p2874_p3 }
  0xb8   : > { %2214 = dma.done.wait (%p2875_p0), [#allocation17], 1024   ;;  %p2876_p5 = pmov %p2875_p0 }
  0xb9   : > { %s1513_s28 = sshll.u32 %s2537_s17, 6  ;;  %v344_v0 = vld [vmem:[%s294_s10] sm:$0xff]  ;;  %v345_v1 = vld [vmem:[%s294_s10 + $0x8] sm:$0xff]  ;;  %v346_v2 = vld [vmem:[%s294_s10 + $0x10] sm:$0xff]  ;;  %s2560_s19 = smov 0  }
  0xba   : > { %2216 = vsyncadd (%p2876_p5), [#allocation17], 4294966272  ;;  %348 = vst [vmem:[#allocation2] sm:$0xff] %v344_v0  ;;  %v347_v3 = vld [vmem:[%s294_s10 + $0x18] sm:$0xff]  ;;  %s2558_s18 = scalar_lea.vmem [#allocation18], %s1513_s28 }
  0xbb   : > { %349 = vst [vmem:[#allocation2 + $0x8] sm:$0xff] %v345_v1  ;;  %350 = vst [vmem:[#allocation2 + $0x10] sm:$0xff] %v346_v2 }
  0xbc   : > { %351 = vst [vmem:[#allocation2 + $0x18] sm:$0xff] %v347_v3 }
  0xbd LB: >> { %v2251_v9 = vmov 0.0   ;;  %vm2252_vm0 = vmmov 0   ;;  %s1569_s29 = smul.u32 84, %s2239_s19  ;;  %s1575_s30 = sshll.u32 %s2239_s19, 4  ;;  %vm441_vm1 = vcmask 261120   ;;  %s2239_s19 = sphi %s2560_s19, %s357_s19  }
  0xbe   : >> { %1643 = vmatprep.subr.bf16.mxu0 %v2251_v9  ;;  %1647 = vmatprep.mubr.msk.bf16.mxu0 %vm2252_vm0, %v2251_v9  ;;  %s676_s8 = scalar_lea.vmem [#allocation10], %s1575_s30  ;;  %s2589_s9 = scalar_lea.vmem [#allocation15], %s1575_s30 }
  0xbf   : >> { %v1902_v11 = vld [vmem:[%s676_s8] sm:$0xff]   ;;  %s2583_s7 = scalar_lea.vmem [#allocation12], %s1569_s29  ;;  %v1905_v14 = vld [vmem:[%s676_s8 + $0x8] sm:$0xff]   ;;  %s611_s13 = smul.u32 40, %s2239_s19 }
  0xc0   : >> { %v1895_v12 = vld [vmem:[%s2583_s7] sm:$0xff]   ;;  %1691 = vmatprep.subr.bf16.mxu1 %v1902_v11  ;;  %v1896_v13 = vld [vmem:[%s2583_s7 + $0x8] sm:$0xff]   ;;  %v1897_v15 = vld [vmem:[%s2583_s7 + $0x10] sm:$0xff]   ;;  %s1558_s26 = sshll.u32 %s2239_s19, 5  ;;  %s357_s19 = sadd.s32 1, %s2239_s19  }
  0xc1   : >> { %v2565_v4 = vld [vmem:[#allocation2] sm:$0xff]  ;;  %1692 = vmatpush3.bf16.msra.mxu1 %v1902_v11  ;;  %v1898_v16 = vld [vmem:[%s2583_s7 + $0x18] sm:$0xff]   ;;  %v1900_v18 = vld [vmem:[%s2583_s7 + $0x28] sm:$0xff]   ;;  %s2671_s14 = scalar_lea.vmem [#allocation13], %s611_s13  ;;  %s1236_s16 = scalar_lea.vmem [#allocation16], %s1558_s26 }
  0xc2   : >> { %v2567_v5 = vld [vmem:[#allocation2 + $0x8] sm:$0xff]  ;;  %v2569_v6 = vld [vmem:[#allocation2 + $0x10] sm:$0xff]  ;;  %1693 = vmatprep.subr.bf16.mxu1 %v1905_v14  ;;  %v1899_v17 = vld [vmem:[%s2583_s7 + $0x20] sm:$0xff]   ;;  %s1338_s20 = scalar_lea.vmem %s2558_s18, %s1558_s26 [#allocation18]  ;;  %p354_p2 = scmp.ge.s32.totalorder %s357_s19, 2  }
  0xc3   : >> { %v362_v7 = vpack.c.bf16 %v2567_v5, %v2565_v4  ;;  %v2573_v8 = vld [vmem:[#allocation2 + $0x18] sm:$0xff]  ;;  %v1901_v19 = vld [vmem:[%s2583_s7 + $0x30] sm:$0xff]   ;;  %s1577_s10 = sshll.u32 (%p354_p2), %s2313_s27, 10  ;;  %s1357_s8 = sshll.u32 (%p354_p2), %s2558_s18, 4  ;;  %s2805_s8 = int_to_ptr.vmem [resolvable:$true] %s1357_s8 }
  0xc4   : >> { %v363_v10 = vpack.c.bf16 %v2573_v8, %v2569_v6  ;;  %v1904_v20 = vld [vmem:[%s2583_s7 + $0x38] sm:$0xff]   ;;  %s2802_s30 = scalar_lea.hbm (%p354_p2), %s2855_s6, %s1577_s10  ;;  %p2877_p10 = scmp.ne.s32.totalorder (%p354_p2), %s2867_s11, 0 }
  0xc5   : >> { %681 = vxpose.xlu0.c.b16.start [1/2] (short) %v362_v7, 128  ;;  %1644 = vmatpush3.bf16.msra.mxu0 %v362_v7  ;;  %s2254_s19 = smov (%p354_p2), [#allocation18]  }
  0xc6   : >> { %1645 = vmatprep.subr.bf16.mxu0 %v2251_v9  ;;  %1694 = vmatpush3.bf16.msra.mxu1 %v1905_v14  ;;  %s2157_s13 = sshll.u32 (%p354_p2), %s2254_s19, 4  ;;  %s2158_s13 = int_to_ptr.vmem [resolvable:$false] %s2157_s13 }
  0xc7   : > { %s2159_s27 = scalar_lea.vmem (%p354_p2), %s2158_s13, 2048  ;;  %p2160_p12 = scmp.lt.s32.totalorder (%p354_p2), %s2805_s8, %s2158_s13 }
  0xc9   : >> { %682 = vxpose.xlu0.c.b16.end [2/2] (short) %v363_v10, 128  ;;  %1646 = vmatpush3.bf16.msra.mxu0 %v363_v10 }
  0xcc   : >> { %1648 = vmatmul.mubr.msk.bf16.vlgmr.msra.gmra.mrb[0].mxu0 %vm441_vm1, %v1895_v12 }
  0xcd   : >> { %1651 = vmatprep.mubr.msk.bf16.mxu0 %vm2252_vm0, %v2251_v9 }
  0xd4   : >> { %1652 = vmatmul.mubr.msk.bf16.gmra.mrb[4].mxu0 %vm441_vm1, %v1896_v13 }
  0xd5   : >> { %1655 = vmatprep.mubr.msk.bf16.mxu0 %vm2252_vm0, %v2251_v9 }
  0xdc   : >> { %1656 = vmatmul.mubr.msk.bf16.gmra.mrb[8].mxu0 %vm441_vm1, %v1897_v15 }
  0xdd   : >> { %1659 = vmatprep.mubr.msk.bf16.mxu0 %vm2252_vm0, %v2251_v9 }
  0xe4   : >> { %1660 = vmatmul.mubr.msk.bf16.gmra.mrb[12].mxu0 %vm441_vm1, %v1898_v16 }
  0xe5   : >> { %1663 = vmatprep.mubr.msk.bf16.mxu0 %vm2252_vm0, %v2251_v9 }
  0xec   : >> { %1664 = vmatmul.mubr.msk.bf16.gmra.mrb[16].mxu0 %vm441_vm1, %v1899_v17 }
  0xed   : >> { %1667 = vmatprep.mubr.msk.bf16.mxu0 %vm2252_vm0, %v2251_v9 }
  0xf4   : >> { %1668 = vmatmul.mubr.msk.bf16.gmra.mrb[20].mxu0 %vm441_vm1, %v1900_v18 }
  0xf5   : >> { %1671 = vmatprep.mubr.msk.bf16.mxu0 %vm2252_vm0, %v2251_v9 }
  0xfc   : >> { %1672 = vmatmul.mubr.msk.bf16.gmra.mrb[24].mxu0 %vm441_vm1, %v1901_v19 }
  0xfd   : >> { %1675 = vmatprep.mubr.msk.bf16.mxu0 %vm2252_vm0, %v2251_v9 }
 0x104   : >> { %1676 = vmatmul.mubr.msk.bf16.gmra.mrb[28].mxu0 %vm441_vm1, %v1904_v20 }
 0x105   : >> { %1679 = vmatprep.mubr.msk.bf16.mxu0 %vm2252_vm0, %v2251_v9 }
 0x12b   : >> { %v689_v21 = vpop.trf.xlu0 }
 0x12c   : >> { %1695 = vmatprep.mubr.msk.bf16.mxu1 %vm441_vm1, %v689_v21 }
 0x12f   : >> { %v690_v22 = vpop.trf.xlu0 }
 0x130   : >> { %1696 = vmatmul.mubr.msk.bf16.vlgmr.msra.gmra.mrb[0].mxu1 %vm441_vm1, %v690_v22 }
 0x133   : >> { %v691_v23 = vpop.trf.xlu0 }
 0x134   : >> { %1699 = vmatprep.mubr.msk.bf16.mxu1 %vm441_vm1, %v691_v23 }
 0x137   : >> { %v692_v24 = vpop.trf.xlu0 }
 0x138   : >> { %1700 = vmatmul.mubr.msk.bf16.gmra.mrb[4].mxu1 %vm441_vm1, %v692_v24 }
 0x13b   : >> { %v693_v25 = vpop.trf.xlu0 }
 0x13c   : >> { %1703 = vmatprep.mubr.msk.bf16.mxu1 %vm441_vm1, %v693_v25 }
 0x13f   : >> { %v694_v26 = vpop.trf.xlu0 }
 0x140   : >> { %1704 = vmatmul.mubr.msk.bf16.gmra.mrb[8].mxu1 %vm441_vm1, %v694_v26 }
 0x143   : >> { %v695_v27 = vpop.trf.xlu0 }
 0x144   : >> { %1707 = vmatprep.mubr.msk.bf16.mxu1 %vm441_vm1, %v695_v27 }
 0x147   : >> { %v696_v28 = vpop.trf.xlu0 }
 0x148   : >> { %1708 = vmatmul.mubr.msk.bf16.gmra.mrb[12].mxu1 %vm441_vm1, %v696_v28 }
 0x19f   : >> { %v509_v29 = vpop.f32.mrb[0].mxu0 }
 0x1a0   : >> { %v1649_v30 = vpop.f32.mrb[1].mxu0 }
 0x1a1   : >> { %v512_v31 = vpop.f32.mrb[2].mxu0 }
 0x1a2   : >> { %v595_v32 = vpack.c.bf16 %v512_v31, %v509_v29  ;;  %v1650_v33 = vpop.f32.mrb[3].mxu0 }
 0x1a4   : >> { %1711 = vmatprep.subr.bf16.mxu1 %v595_v32 }
 0x1a5   : >> { %1712 = vmatpush3.bf16.msra.mxu1 %v595_v32 }
 0x1a7   : >> { %v517_v34 = vpop.f32.mrb[4].mxu0 }
 0x1a8   : >> { %v1653_v35 = vpop.f32.mrb[5].mxu0 }
 0x1a9   : >> { %v520_v36 = vpop.f32.mrb[6].mxu0  ;;  %v2253_v35 = vmov 0  }
 0x1aa   : >> { %v596_v37 = vpack.c.bf16 %v520_v36, %v517_v34  ;;  %v1654_v38 = vpop.f32.mrb[7].mxu0  ;;  %v1906_v34 = vld [vmem:[%s2583_s7 + $0x40] sm:$0xff]   ;;  %1893 = vset.pattern.permute.xlu1 %v2253_v35  ;;  %1894 = vset.pattern.permute.xlu0 %v2253_v35  ;;  %v1907_v36 = vld [vmem:[%s2583_s7 + $0x48] sm:$0xff]  }
 0x1ab   : >> { %1680 = vmatmul.mubr.msk.bf16.gmra.mrb[32].mxu0 %vm441_vm1, %v1906_v34 }
 0x1ac   : >> { %1713 = vmatprep.subr.bf16.mxu1 %v596_v37  ;;  %1683 = vmatprep.mubr.msk.bf16.mxu0 %vm2252_vm0, %v2251_v9 }
 0x1ad   : >> { %1714 = vmatpush3.bf16.msra.mxu1 %v596_v37 }
 0x1af   : >> { %v525_v39 = vpop.f32.mrb[8].mxu0 }
 0x1b0   : >> { %v1657_v40 = vpop.f32.mrb[9].mxu0 }
 0x1b1   : >> { %v528_v41 = vpop.f32.mrb[10].mxu0 }
 0x1b2   : >> { %v597_v42 = vpack.c.bf16 %v528_v41, %v525_v39  ;;  %v1658_v43 = vpop.f32.mrb[11].mxu0 }
 0x1b3   : >> { %1684 = vmatmul.mubr.msk.bf16.gmra.mrb[36].mxu0 %vm441_vm1, %v1907_v36 }
 0x1b4   : >> { %1715 = vmatprep.subr.bf16.mxu1 %v597_v42  ;;  %1687 = vmatprep.mubr.msk.bf16.mxu0 %vm2252_vm0, %v2251_v9 }
 0x1b5   : >> { %1716 = vmatpush3.bf16.msra.mxu1 %v597_v42 }
 0x1b7   : >> { %v533_v44 = vpop.f32.mrb[12].mxu0 }
 0x1b8   : >> { %v1661_v45 = vpop.f32.mrb[13].mxu0 }
 0x1b9   : >> { %v536_v46 = vpop.f32.mrb[14].mxu0 }
 0x1ba   : >> { %v598_v47 = vpack.c.bf16 %v536_v46, %v533_v44  ;;  %v1662_v48 = vpop.f32.mrb[15].mxu0 }
 0x1bc   : >> { %1717 = vmatprep.subr.bf16.mxu1 %v598_v47 }
 0x1bd   : >> { %1718 = vmatpush3.bf16.msra.mxu1 %v598_v47 }
 0x1bf   : >> { %v541_v49 = vpop.f32.mrb[16].mxu0 }
 0x1c0   : >> { %v1665_v50 = vpop.f32.mrb[17].mxu0 }
 0x1c1   : >> { %v544_v51 = vpop.f32.mrb[18].mxu0 }
 0x1c2   : >> { %v599_v52 = vpack.c.bf16 %v544_v51, %v541_v49  ;;  %v1666_v53 = vpop.f32.mrb[19].mxu0  ;;  %v1908_v49 = vld [vmem:[%s2583_s7 + $0x50] ss:$0 sps:$4 sm:$0xff]   ;;  %s1344_s7 = scalar_lea.sflag (%p354_p2), [#allocation9], %s2537_s17 }
 0x1c3   : >> { %1688 = vmatmul.mubr.msk.bf16.gmra.mrb[40].mxu0 %vm441_vm1, %v1908_v49 }
 0x1c4   : >> { %1719 = vmatprep.subr.bf16.mxu1 %v599_v52 }
 0x1c5   : >> { %1720 = vmatpush3.bf16.msra.mxu1 %v599_v52 }
 0x1c7   : >> { %v549_v54 = vpop.f32.mrb[20].mxu0 }
 0x1c8   : >> { %v1669_v55 = vpop.f32.mrb[21].mxu0 }
 0x1c9   : >> { %v552_v56 = vpop.f32.mrb[22].mxu0 }
 0x1ca   : >> { %v600_v57 = vpack.c.bf16 %v552_v56, %v549_v54  ;;  %v1670_v58 = vpop.f32.mrb[23].mxu0  ;;  %v613_v54 = vld [vmem:[%s2671_s14] sm:$0xff] }
 0x1cc   : >> { %1721 = vmatprep.subr.bf16.mxu1 %v600_v57 }
 0x1cd   : >> { %1722 = vmatpush3.bf16.msra.mxu1 %v600_v57 }
 0x1cf   : >> { %v557_v59 = vpop.f32.mrb[24].mxu0 }
 0x1d0   : >> { %v1673_v60 = vpop.f32.mrb[25].mxu0 }
 0x1d1   : >> { %v560_v61 = vpop.f32.mrb[26].mxu0 }
 0x1d2   : >> { %v601_v62 = vpack.c.bf16 %v560_v61, %v557_v59  ;;  %v1674_v63 = vpop.f32.mrb[27].mxu0 }
 0x1d4   : >> { %1723 = vmatprep.subr.bf16.mxu1 %v601_v62 }
 0x1d5   : >> { %1724 = vmatpush3.bf16.msra.mxu1 %v601_v62 }
 0x1d7   : >> { %v565_v0 = vpop.f32.mrb[28].mxu0 }
 0x1d8   : >> { %v1677_v1 = vpop.f32.mrb[29].mxu0 }
 0x1d9   : >> { %v568_v2 = vpop.f32.mrb[30].mxu0 }
 0x1da   : >> { %v602_v3 = vpack.c.bf16 %v568_v2, %v565_v0  ;;  %v1678_v7 = vpop.f32.mrb[31].mxu0 }
 0x1dc   : >> { %1725 = vmatprep.subr.bf16.mxu1 %v602_v3 }
 0x1dd   : >> { %1726 = vmatpush3.bf16.msra.mxu1 %v602_v3 }
 0x1de   : >> { %1743 = vmatprep.subr.bf16.mxu1 %v2251_v9 }
 0x203   : >> { %v1697_v10 = vpop.f32.mrb[0].mxu1 }
 0x204   : >> { %v767_v11 = vpop.f32.mrb[1].mxu1 }
 0x205   : >> { %v1698_v12 = vpop.f32.mrb[2].mxu1 }
 0x206   : >> { %v831_v13 = vpack.c.bf16 %v1698_v12, %v1697_v10  ;;  %v770_v14 = vpop.f32.mrb[3].mxu1 }
 0x207   : >> { %v830_v15 = vpack.c.bf16 %v770_v14, %v767_v11 }
 0x209   : >> { %1727 = vmatprep.mubr.bf16.mxu1 %v830_v15 }
 0x20a   : >> { %1728 = vmatmul.mubr.bf16.vlgmr.msra.gmra.mrb[16].mxu1 %v831_v13 }
 0x20b   : >> { %v1701_v16 = vpop.f32.mrb[4].mxu1 }
 0x20c   : >> { %v783_v17 = vpop.f32.mrb[5].mxu1 }
 0x20d   : >> { %v1702_v18 = vpop.f32.mrb[6].mxu1 }
 0x20e   : >> { %v833_v19 = vpack.c.bf16 %v1702_v18, %v1701_v16  ;;  %v786_v20 = vpop.f32.mrb[7].mxu1 }
 0x20f   : >> { %v832_v21 = vpack.c.bf16 %v786_v20, %v783_v17 }
 0x211   : >> { %1731 = vmatprep.mubr.bf16.mxu1 %v832_v21 }
 0x212   : >> { %1732 = vmatmul.mubr.bf16.gmra.mrb[20].mxu1 %v833_v19 }
 0x213   : >> { %v1705_v22 = vpop.f32.mrb[8].mxu1 }
 0x214   : >> { %v799_v23 = vpop.f32.mrb[9].mxu1 }
 0x215   : >> { %v1706_v24 = vpop.f32.mrb[10].mxu1 }
 0x216   : >> { %v835_v25 = vpack.c.bf16 %v1706_v24, %v1705_v22  ;;  %v802_v26 = vpop.f32.mrb[11].mxu1 }
 0x217   : >> { %v834_v27 = vpack.c.bf16 %v802_v26, %v799_v23 }
 0x219   : >> { %1735 = vmatprep.mubr.bf16.mxu1 %v834_v27 }
 0x21a   : >> { %1736 = vmatmul.mubr.bf16.gmra.mrb[24].mxu1 %v835_v25 }
 0x21b   : >> { %v1709_v28 = vpop.f32.mrb[12].mxu1 }
 0x21c   : >> { %v815_v29 = vpop.f32.mrb[13].mxu1 }
 0x21d   : >> { %v1710_v30 = vpop.f32.mrb[14].mxu1 }
 0x21e   : >> { %v837_v31 = vpack.c.bf16 %v1710_v30, %v1709_v28  ;;  %v818_v32 = vpop.f32.mrb[15].mxu1 }
 0x21f   : >> { %v836_v33 = vpack.c.bf16 %v818_v32, %v815_v29 }
 0x221   : >> { %1739 = vmatprep.mubr.bf16.mxu1 %v836_v33 }
 0x222   : >> { %1740 = vmatmul.mubr.bf16.gmra.mrb[28].mxu1 %v837_v31 }
 0x223   : >> { %1759 = vmatprep.mubr.msk.bf16.mxu1 %vm2252_vm0, %v2251_v9 }
 0x27e   : >> { %v2674_v55 = vpop.f32.mrb[32].mxu0 }
 0x27f   : >> { %v1681_v56 = vpop.f32.mrb[33].mxu0 }
 0x2dd   : >> { %v1729_v37 = vpop.f32.mrb[16].mxu1 }
 0x2de   : >> { %968 = vmax.xlane.f32.xlu0 %v1729_v37  ;;  %v901_v38 = vpop.f32.mrb[17].mxu1 }
 0x2df   : >> { %964 = vmax.xlane.f32.xlu1 %v901_v38  ;;  %v1730_v39 = vpop.f32.mrb[18].mxu1 }
 0x2e0   : >> { %v904_v40 = vpop.f32.mrb[19].mxu1 }
 0x2e3   : >> { %970 = vmax.xlane.f32.xlu1 %v1730_v39 }
 0x2e5   : >> { %v1733_v41 = vpop.f32.mrb[20].mxu1 }
 0x2e6   : >> { %v917_v42 = vpop.f32.mrb[21].mxu1 }
 0x2e7   : >> { %966 = vmax.xlane.f32.xlu1 %v904_v40  ;;  %v2638_v43 = vpop.f32.mrb[22].mxu1 }
 0x2e8   : >> { %v2640_v44 = vpop.f32.mrb[23].mxu1 }
 0x2eb   : >> { %976 = vmax.xlane.f32.xlu1 %v1733_v41 }
 0x2ed   : >> { %v2642_v45 = vpop.f32.mrb[24].mxu1 }
 0x2ee   : >> { %v2644_v46 = vpop.f32.mrb[25].mxu1 }
 0x2ef   : >> { %972 = vmax.xlane.f32.xlu1 %v917_v42  ;;  %v2646_v47 = vpop.f32.mrb[26].mxu1 }
 0x2f0   : >> { %v2648_v48 = vpop.f32.mrb[27].mxu1 }
 0x2f3   : >> { %978 = vmax.xlane.f32.xlu1 %v2638_v43 }
 0x2f5   : >> { %v2653_v50 = vpop.f32.mrb[28].mxu1 }
 0x2f6   : >> { %v2655_v51 = vpop.f32.mrb[29].mxu1 }
 0x2f7   : >> { %974 = vmax.xlane.f32.xlu1 %v2640_v44  ;;  %v2658_v52 = vpop.f32.mrb[30].mxu1 }
 0x2f8   : >> { %v2660_v53 = vpop.f32.mrb[31].mxu1 }
 0x2f9   : >> { %990 = vmax.xlane.f32.xlu0 %v2660_v53 }
 0x2fb   : >> { %984 = vmax.xlane.f32.xlu1 %v2642_v45 }
 0x2fd   : >> { %994 = vmax.xlane.f32.xlu0 %v2658_v52 }
 0x2ff   : >> { %980 = vmax.xlane.f32.xlu1 %v2644_v46 }
 0x303   : >> { %986 = vmax.xlane.f32.xlu1 %v2646_v47 }
 0x307   : >> { %982 = vmax.xlane.f32.xlu1 %v2648_v48 }
 0x30b   : >> { %992 = vmax.xlane.f32.xlu1 %v2653_v50 }
 0x30f   : >> { %988 = vmax.xlane.f32.xlu1 %v2655_v51 }
 0x320   : >> { %620 = vperm.xlu1 %1893, %v613_v54  }
 0x36b   : >> { %v969_v57 = vpop.xlane.xlu0 %968 }
 0x36c   : >> { %v998_v58 = vsub.f32 %v1729_v37, %v969_v57  ;;  %v965_v59 = vpop.xlane.xlu1 %964 }
 0x36d   : >> { %v996_v60 = vsub.f32 %v901_v38, %v965_v59 }
 0x36e   : >> { %v1016_v61 = vmul.f32 1.442695, %v998_v58 }
 0x36f   : >> { %v1012_v62 = vmul.f32 1.442695, %v996_v60 }
 0x370   : >> { %1913 = vpow2.f32 %v1016_v61  ;;  %v971_v63 = vpop.xlane.xlu1 %970 }
 0x371   : >> { %v999_v0 = vsub.f32 %v1730_v39, %v971_v63  ;;  %1915 = vpow2.f32 %v1012_v62  ;;  %v615_v63 = vld [vmem:[%s2671_s14 + $0x10] sm:$0xff] }
 0x373   : >> { %v1018_v1 = vmul.f32 1.442695, %v999_v0  ;;  %v2735_v0 = vpop.f32.mrb[34].mxu0 }
 0x374   : >> { %v967_v2 = vpop.xlane.xlu1 %966 }
 0x375   : >> { %1917 = vpow2.f32 %v1018_v1  ;;  %v997_v3 = vsub.f32 %v904_v40, %v967_v2  ;;  %v1682_v1 = vpop.f32.mrb[35].mxu0 }
 0x376   : >> { %v2737_v2 = vpop.f32.mrb[36].mxu0 }
 0x377   : >> { %v1014_v7 = vmul.f32 1.442695, %v997_v3  ;;  %v616_v3 = vld [vmem:[%s2671_s14 + $0x18] sm:$0xff] }
 0x378   : >> { %v977_v10 = vpop.xlane.xlu1 %976 }
 0x379   : >> { %1919 = vpow2.f32 %v1014_v7  ;;  %v1002_v11 = vsub.f32 %v1733_v41, %v977_v10  ;;  %v1685_v7 = vpop.f32.mrb[37].mxu0  ;;  %v614_v10 = vld [vmem:[%s2671_s14 + $0x8] sm:$0xff] }
 0x37a   : >> { %v2676_v12 = vpop.eup %1913 }
 0x37b   : >> { %v1024_v13 = vmul.f32 1.442695, %v1002_v11  ;;  %1048 = vadd.xlane.f32.xlu1 %v2676_v12  ;;  %v2679_v16 = vpop.eup %1915  ;;  %v617_v11 = vld [vmem:[%s2671_s14 + $0x20] sm:$0xff] }
 0x37c   : >> { %v973_v14 = vpop.xlane.xlu1 %972 }
 0x37d   : >> { %1921 = vpow2.f32 %v1024_v13  ;;  %v1000_v15 = vsub.f32 %v917_v42, %v973_v14  ;;  %v2743_v13 = vpop.f32.mrb[38].mxu0 }
 0x37e   : >> { %v1686_v14 = vpop.f32.mrb[39].mxu0 }
 0x37f   : >> { %v2681_v17 = vpop.eup %1917  ;;  %v1020_v18 = vmul.f32 1.442695, %v1000_v15  ;;  %1044 = vadd.xlane.f32.xlu1 %v2679_v16  ;;  %v1237_v15 = vld [vmem:[%s1236_s16] sm:$0xff] }
 0x380   : >> { %v979_v19 = vpop.xlane.xlu1 %978  ;;  %1050 = vadd.xlane.f32.xlu0 %v2681_v17 }
 0x381   : >> { %1923 = vpow2.f32 %v1020_v18  ;;  %v1003_v20 = vsub.f32 %v2638_v43, %v979_v19  ;;  %v2747_v18 = vpop.f32.mrb[40].mxu0 }
 0x382   : >> { %v1689_v19 = vpop.f32.mrb[41].mxu0 }
 0x383   : >> { %v2686_v21 = vpop.eup %1919  ;;  %v1026_v22 = vmul.f32 1.442695, %v1003_v20  ;;  %v592_v20 = vpop.f32.mrb[42].mxu0 }
 0x384   : >> { %v975_v23 = vpop.xlane.xlu1 %974  ;;  %1046 = vadd.xlane.f32.xlu0 %v2686_v21 }
 0x385   : >> { %1925 = vpow2.f32 %v1026_v22  ;;  %v1001_v24 = vsub.f32 %v2640_v44, %v975_v23  ;;  %v1690_v22 = vpop.f32.mrb[43].mxu0  ;;  %v1238_v23 = vld [vmem:[%s1236_s16 + $0x8] sm:$0xff] }
 0x386   : >> { %v991_v30 = vpop.xlane.xlu0 %990 }
 0x387   : >> { %v2690_v25 = vpop.eup %1921  ;;  %v1022_v26 = vmul.f32 1.442695, %v1001_v24  ;;  %v1239_v24 = vld [vmem:[%s1236_s16 + $0x10] sm:$0xff] }
 0x388   : >> { %v985_v27 = vpop.xlane.xlu1 %984  ;;  %1056 = vadd.xlane.f32.xlu1 %v2690_v25 }
 0x389   : >> { %1927 = vpow2.f32 %v1022_v26  ;;  %v1006_v28 = vsub.f32 %v2642_v45, %v985_v27  ;;  %v1240_v26 = vld [vmem:[%s1236_s16 + $0x18] sm:$0xff] }
 0x38a   : >> { %v995_v37 = vpop.xlane.xlu0 %994 }
 0x38b   : >> { %v2694_v29 = vpop.eup %1923  ;;  %v1032_v31 = vmul.f32 1.442695, %v1006_v28  ;;  %v1011_v41 = vsub.f32 %v2658_v52, %v995_v37 }
 0x38c   : >> { %v981_v32 = vpop.xlane.xlu1 %980  ;;  %1052 = vadd.xlane.f32.xlu1 %v2694_v29 }
 0x38d   : >> { %1929 = vpow2.f32 %v1032_v31  ;;  %v1004_v33 = vsub.f32 %v2644_v46, %v981_v32  ;;  %v1009_v46 = vsub.f32 %v2660_v53, %v991_v30  ;;  %v1042_v49 = vmul.f32 1.442695, %v1011_v41 }
 0x38f   : >> { %v2698_v34 = vpop.eup %1925  ;;  %v1028_v35 = vmul.f32 1.442695, %v1004_v33  ;;  %v1038_v57 = vmul.f32 1.442695, %v1009_v46 }
 0x390   : >> { %v987_v36 = vpop.xlane.xlu1 %986  ;;  %1058 = vadd.xlane.f32.xlu0 %v2698_v34 }
 0x391   : >> { %1931 = vpow2.f32 %v1028_v35  ;;  %v1007_v38 = vsub.f32 %v2646_v47, %v987_v36 }
 0x393   : >> { %v2702_v39 = vpop.eup %1927  ;;  %v1034_v40 = vmul.f32 1.442695, %v1007_v38 }
 0x394   : >> { %v983_v42 = vpop.xlane.xlu1 %982  ;;  %1054 = vadd.xlane.f32.xlu0 %v2702_v39 }
 0x395   : >> { %1933 = vpow2.f32 %v1034_v40  ;;  %v1005_v43 = vsub.f32 %v2648_v48, %v983_v42 }
 0x397   : >> { %v2707_v44 = vpop.eup %1929  ;;  %v1030_v45 = vmul.f32 1.442695, %v1005_v43 }
 0x398   : >> { %v993_v54 = vpop.xlane.xlu1 %992  ;;  %1064 = vadd.xlane.f32.xlu1 %v2707_v44 }
 0x399   : >> { %1935 = vpow2.f32 %v1030_v45  ;;  %v1010_v47 = vsub.f32 %v2653_v50, %v993_v54 }
 0x39a   : >> { %1937 = vpow2.f32 %v1042_v49 }
 0x39b   : >> { %v2712_v56 = vpop.eup %1931  ;;  %v1040_v52 = vmul.f32 1.442695, %v1010_v47 }
 0x39c   : >> { %1060 = vadd.xlane.f32.xlu1 %v2712_v56  ;;  %v989_v48 = vpop.xlane.xlu1 %988 }
 0x39d   : >> { %1939 = vpow2.f32 %v1040_v52  ;;  %v1008_v58 = vsub.f32 %v2655_v51, %v989_v48 }
 0x39e   : >> { %1941 = vpow2.f32 %v1038_v57 }
 0x39f   : >> { %v2716_v53 = vpop.eup %1933  ;;  %v1036_v59 = vmul.f32 1.442695, %v1008_v58 }
 0x3a0   : >> { %1066 = vadd.xlane.f32.xlu0 %v2716_v53  ;;  %v2749_v27 = vpop.permute.xlu1 %620 }
 0x3a1   : >> { %1943 = vpow2.f32 %v1036_v59 }
 0x3a3   : >> { %v2719_v50 = vpop.eup %1935 }
 0x3a4   : >> { %1062 = vadd.xlane.f32.xlu0 %v2719_v50  ;;  %v2722_v60 = vpop.eup %1937 }
 0x3a7   : >> { %v2724_v61 = vpop.eup %1939 }
 0x3a8   : >> { %1072 = vadd.xlane.f32.xlu1 %v2724_v61  ;;  %1074 = vadd.xlane.f32.xlu0 %v2722_v60  ;;  %v2728_v51 = vpop.eup %1941 }
 0x3ab   : >> { %v2730_v62 = vpop.eup %1943 }
 0x3ac   : >> { %1068 = vadd.xlane.f32.xlu1 %v2730_v62  ;;  %1070 = vadd.xlane.f32.xlu0 %v2728_v51 }
 0x3bd   : >> { %630 = vperm.xlu1 %1893, %v615_v63  }
 0x3c1   : >> { %635 = vperm.xlu1 %1893, %v616_v3  }
 0x3c2   : >> { %625 = vperm.xlu0 %1894, %v614_v10  }
 0x3c5   : >> { %640 = vperm.xlu1 %1893, %v617_v11  }
 0x3c9   : >> { %1243 = vperm.xlu1 %1893, %v1237_v15  }
 0x3cd   : >> { %1248 = vperm.xlu1 %1893, %v1238_v23  }
 0x3d1   : >> { %1253 = vperm.xlu1 %1893, %v1239_v24  }
 0x3d5   : >> { %1258 = vperm.xlu1 %1893, %v1240_v26  }
 0x408   : >> { %v1049_v28 = vpop.xlane.xlu1 %1048 }
 0x40c   : >> { %v1045_v30 = vpop.xlane.xlu1 %1044 }
 0x40d   : >> { %v1051_v31 = vpop.xlane.xlu0 %1050  ;;  %1945 = vrcp.f32 %v1045_v30 }
 0x40e   : >> { %1947 = vrcp.f32 %v1051_v31 }
 0x411   : >> { %v1047_v32 = vpop.xlane.xlu0 %1046 }
 0x412   : >> { %1949 = vrcp.f32 %v1047_v32 }
 0x413   : >> { %1951 = vrcp.f32 %v1049_v28 }
 0x415   : >> { %v1057_v33 = vpop.xlane.xlu1 %1056 }
 0x417   : >> { %v1946_v35 = vpop.eup %1945 }
 0x418   : >> { %v1948_v36 = vpop.eup %1947  ;;  %v1092_v41 = vmul.f32 %v1946_v35, %v2679_v16 }
 0x419   : >> { %v1053_v38 = vpop.xlane.xlu1 %1052  ;;  %v1095_v46 = vmul.f32 %v1948_v36, %v2681_v17 }
 0x41a   : >> { %1953 = vrcp.f32 %v1053_v38 }
 0x41c   : >> { %v1950_v37 = vpop.eup %1949 }
 0x41d   : >> { %v1059_v40 = vpop.xlane.xlu0 %1058  ;;  %v1093_v42 = vmul.f32 %v1950_v37, %v2686_v21  ;;  %v1952_v43 = vpop.eup %1951 }
 0x41e   : >> { %1955 = vrcp.f32 %v1059_v40  ;;  %v1094_v54 = vmul.f32 %v1952_v43, %v2676_v12 }
 0x41f   : >> { %v1108_v45 = vpack.c.bf16 %v1093_v42, %v1092_v41 }
 0x420   : >> { %v1109_v47 = vpack.c.bf16 %v1095_v46, %v1094_v54 }
 0x421   : >> { %1744 = vmatpush3.bf16.msra.mxu1 %v1108_v45  ;;  %v1055_v49 = vpop.xlane.xlu0 %1054 }
 0x422   : >> { %1957 = vrcp.f32 %v1055_v49  ;;  %1745 = vmatprep.subr.bf16.mxu1 %v2251_v9 }
 0x423   : >> { %1959 = vrcp.f32 %v1057_v33  ;;  %v643_v33 = vadd.f32 %v2749_v27, %v2674_v55 }
 0x424   : >> { %v1954_v21 = vpop.eup %1953 }
 0x425   : >> { %1746 = vmatpush3.bf16.msra.mxu1 %v1109_v47  ;;  %v1065_v16 = vpop.xlane.xlu1 %1064  ;;  %v1096_v58 = vmul.f32 %v1954_v21, %v2694_v29 }
 0x426   : >> { %1747 = vmatprep.subr.bf16.mxu1 %v2251_v9 }
 0x428   : >> { %v1956_v52 = vpop.eup %1955 }
 0x429   : >> { %v1061_v48 = vpop.xlane.xlu1 %1060  ;;  %v1099_v1 = vmul.f32 %v1956_v52, %v2698_v34 }
 0x42a   : >> { %1961 = vrcp.f32 %v1061_v48 }
 0x42c   : >> { %v1958_v57 = vpop.eup %1957 }
 0x42d   : >> { %v1067_v17 = vpop.xlane.xlu0 %1066  ;;  %v1097_v59 = vmul.f32 %v1958_v57, %v2702_v39  ;;  %v1960_v63 = vpop.eup %1959 }
 0x42e   : >> { %1963 = vrcp.f32 %v1067_v17  ;;  %v1098_v7 = vmul.f32 %v1960_v63, %v2690_v25 }
 0x42f   : >> { %v1110_v12 = vpack.c.bf16 %v1097_v59, %v1096_v58  ;;  %v1215_v58 = vlaneseq }
 0x430   : >> { %v1111_v10 = vpack.c.bf16 %v1099_v1, %v1098_v7 }
 0x431   : >> { %1748 = vmatpush3.bf16.msra.mxu1 %v1110_v12  ;;  %v1063_v3 = vpop.xlane.xlu0 %1062  ;;  %v1216_v63 = vshrl.u32 %v1215_v58, 7 }
 0x432   : >> { %1965 = vrcp.f32 %v1063_v3  ;;  %1749 = vmatprep.subr.bf16.mxu1 %v2251_v9 }
 0x433   : >> { %1967 = vrcp.f32 %v1065_v16  ;;  %v1217_v12 = vsub.s32 0, %v1216_v63 }
 0x434   : >> { %v1962_v14 = vpop.eup %1961 }
 0x435   : >> { %v1073_v11 = vpop.xlane.xlu1 %1072  ;;  %1750 = vmatpush3.bf16.msra.mxu1 %v1111_v10  ;;  %v1075_v29 = vpop.xlane.xlu0 %1074  ;;  %v1100_v20 = vmul.f32 %v1962_v14, %v2712_v56 }
 0x436   : >> { %1751 = vmatprep.subr.bf16.mxu1 %v2251_v9  ;;  %1969 = vrcp.f32 %v1073_v11 }
 0x437   : >> { %1971 = vrcp.f32 %v1075_v29 }
 0x438   : >> { %v1964_v15 = vpop.eup %1963 }
 0x439   : >> { %v1069_v39 = vpop.xlane.xlu1 %1068  ;;  %v1071_v34 = vpop.xlane.xlu0 %1070  ;;  %v1103_v26 = vmul.f32 %v1964_v15, %v2716_v53 }
 0x43a   : >> { %1973 = vrcp.f32 %v1069_v39 }
 0x43b   : >> { %1975 = vrcp.f32 %v1071_v34 }
 0x43c   : >> { %v1966_v19 = vpop.eup %1965 }
 0x43d   : >> { %v631_v25 = vpop.permute.xlu1 %630  ;;  %v1101_v22 = vmul.f32 %v1966_v19, %v2719_v50  ;;  %v1968_v23 = vpop.eup %1967 }
 0x43e   : >> { %v1102_v31 = vmul.f32 %v1968_v23, %v2707_v44  ;;  %v645_v35 = vadd.f32 %v631_v25, %v2737_v2 }
 0x43f   : >> { %v1112_v24 = vpack.c.bf16 %v1101_v22, %v1100_v20  ;;  %v1903_v20 = vld [vmem:[%s2589_s9 + $0x8] sm:$0xff]  }
 0x440   : >> { %v1970_v32 = vpop.eup %1969  ;;  %v1113_v37 = vpack.c.bf16 %v1103_v26, %v1102_v31 }
 0x441   : >> { %v636_v28 = vpop.permute.xlu1 %635  ;;  %1752 = vmatpush3.bf16.msra.mxu1 %v1112_v24  ;;  %v626_v30 = vpop.permute.xlu0 %625  ;;  %v1106_v27 = vmul.f32 %v1970_v32, %v2724_v61  ;;  %v1912_v61 = vld [vmem:[%s2589_s9] sm:$0xff]   ;;  %s2153_s9 = scalar_lea.vmem (%p354_p2), %s2805_s8, 1024 }
 0x442   : >> { %v644_v36 = vadd.f32 %v626_v30, %v2735_v0  ;;  %v646_v56 = vadd.f32 %v636_v28, %v2743_v13  ;;  %1753 = vmatprep.subr.bf16.mxu1 %v2251_v9  ;;  %v1972_v50 = vpop.eup %1971  ;;  %1775 = vmatprep.mubr.msk.bf16.mxu0 %vm441_vm1, %v1912_v61  ;;  %p2154_p7 = scmp.ne.s32.totalorder (%p354_p2), %s2805_s8, %s2153_s9  ;;  %p2161_p13 = scmp.lt.s32.totalorder (%p354_p2), %s2159_s27, %s2153_s9 }
 0x443   : >> { %v1107_v43 = vmul.f32 %v1972_v50, %v2722_v60 }
 0x444   : >> { %v1974_v53 = vpop.eup %1973  ;;  %v1581_v38 = vpack.c.bf16 %v644_v36, %v643_v33  ;;  %v1586_v40 = vpack.c.bf16 %v646_v56, %v645_v35  ;;  %v1979_v36 = vld [vmem:[#allocation2 + $0x10] sm:$0xff]  ;;  %p2155_p1 = pnand (%p354_p2), %p2154_p7, %p2877_p10  ;;  %p2162_p8 = por (%p354_p2), %p2161_p13, %p2160_p12 }
 0x445   : >> { %v1976_v41 = vpop.eup %1975  ;;  %v641_v42 = vpop.permute.xlu1 %640  ;;  %1754 = vmatpush3.bf16.msra.mxu1 %v1113_v37  ;;  %v1104_v44 = vmul.f32 %v1974_v53, %v2730_v62  ;;  %v1115_v62 = vpack.c.bf16 %v1107_v43, %v1106_v27  ;;  %v1980_v37 = vld [vmem:[#allocation2] sm:$0xff] }
 0x446   : >> { %1582 = vst [vmem:[#allocation5] sm:$0xff] %v1581_v38   ;;  %1588 = vst [vmem:[#allocation5 + $0x8] sm:$0xff] %v1586_v40   ;;  %v647_v55 = vadd.f32 %v641_v42, %v2747_v18  ;;  %1755 = vmatprep.subr.bf16.mxu1 %v2251_v9  ;;  %v1105_v0 = vmul.f32 %v1976_v41, %v2728_v51  ;;  %v1981_v40 = vld [vmem:[#allocation2 + $0x18] sm:$0xff]  ;;  %v1982_v42 = vld [vmem:[#allocation2 + $0x8] sm:$0xff]  ;;  %p2156_p11 = pneg (%p354_p2), %p2155_p1 }
 0x448   : >> { %v1574_v2 = vpack.c.bf16 %v647_v55, %v647_v55  ;;  %v1114_v13 = vpack.c.bf16 %v1105_v0, %v1104_v44  ;;  %p2163_p6 = pnand (%p354_p2), %p2162_p8, %p2156_p11 }
 0x449   : >> { %v1244_v22 = vpop.permute.xlu1 %1243 }
 0x44a   : >> { %673 = vst [vmem:[#allocation5 + $0x10] sm:$0xf] %v1574_v2  ;;  %1756 = vmatpush3.bf16.msra.mxu1 %v1114_v13 }
 0x44b   : >> { %1757 = vmatprep.subr.bf16.mxu1 %v2251_v9 }
 0x44d   : >> { %v1909_v45 = vld [vmem:[#allocation5] sm:$0xff]   ;;  %v1910_v18 = vld [vmem:[#allocation5 + $0x8] sm:$0xff]   ;;  %v1249_v23 = vpop.permute.xlu1 %1248 }
 0x44e   : >> { %1758 = vmatpush3.bf16.msra.mxu1 %v1115_v62 }
 0x451   : >> { %1760 = vmatmul.mubr.bf16.vlgmr.msra.gmra.mrb[32].mxu1 %v1909_v45  ;;  %v1911_v51 = vld [vmem:[#allocation5 + $0x10] ss:$0 sps:$4 sm:$0xff]  }
 0x452   : >> { %1763 = vmatprep.mubr.msk.bf16.mxu1 %vm2252_vm0, %v2251_v9 }
 0x459   : >> { %1764 = vmatmul.mubr.bf16.gmra.mrb[36].mxu1 %v1910_v18 }
 0x45a   : >> { %1767 = vmatprep.mubr.msk.bf16.mxu1 %vm2252_vm0, %v2251_v9 }
 0x461   : >> { %1768 = vmatmul.mubr.bf16.gmra.mrb[40].mxu1 %v1911_v51 }
 0x524   : >> { %v1176_v60 = vpop.f32.mrb[32].mxu1 }
 0x525   : >> { %v1761_v46 = vpop.f32.mrb[33].mxu1 }
 0x526   : >> { %v1179_v49 = vpop.f32.mrb[34].mxu1 }
 0x527   : >> { %v1762_v54 = vpop.f32.mrb[35].mxu1 }
 0x52c   : >> { %v1184_v47 = vpop.f32.mrb[36].mxu1 }
 0x52d   : >> { %v1765_v16 = vpop.f32.mrb[37].mxu1 }
 0x52e   : >> { %v1187_v21 = vpop.f32.mrb[38].mxu1 }
 0x52f   : >> { %v1766_v52 = vpop.f32.mrb[39].mxu1 }
 0x534   : >> { %v1192_v57 = vpop.f32.mrb[40].mxu1 }
 0x535   : >> { %v1213_v48 = vadd.f32 1e-09, %v1192_v57  ;;  %v1769_v17 = vpop.f32.mrb[41].mxu1 }
 0x536   : >> { %v1195_v59 = vpop.f32.mrb[42].mxu1 }
 0x537   : >> { %1977 = vrcp.f32 %v1213_v48  ;;  %v1770_v9 = vpop.f32.mrb[43].mxu1 }
 0x541   : >> { %v1978_v1 = vpop.eup %1977 }
 0x542   : >> { %v1218_v3 = vrot.slane %v1978_v1, %v1217_v12 }
 0x544   : >> { %v1219_v7 = vmul.f32 %v1218_v3, %v1176_v60  ;;  %v1220_v10 = vmul.f32 %v1218_v3, %v1179_v49  ;;  %v1221_v11 = vmul.f32 %v1218_v3, %v1184_v47  ;;  %v1222_v29 = vmul.f32 %v1218_v3, %v1187_v21 }
 0x546   : >> { %v1223_v39 = vsub.f32 %v2565_v4, %v1219_v7  ;;  %v1224_v34 = vsub.f32 %v2567_v5, %v1220_v10  ;;  %v1225_v14 = vsub.f32 %v2569_v6, %v1221_v11  ;;  %v1226_v15 = vsub.f32 %v2573_v8, %v1222_v29  ;;  %v1254_v4 = vpop.permute.xlu1 %1253 }
 0x548   : >> { %v1227_v19 = vpack.c.bf16 %v1224_v34, %v1223_v39  ;;  %v1228_v25 = vpack.c.bf16 %v1226_v15, %v1225_v14 }
 0x54a   : >> { %1771 = vmatprep.subr.bf16.mxu0 %v1227_v19  ;;  %v1259_v6 = vpop.permute.xlu1 %1258 }
 0x54b   : >> { %1772 = vmatpush3.bf16.msra.mxu0 %v1227_v19 }
 0x54c   : >> { %1773 = vmatprep.subr.bf16.mxu0 %v1228_v25 }
 0x54f   : >> { %1774 = vmatpush3.bf16.msra.mxu0 %v1228_v25 }
 0x552   : >> { %1776 = vmatmul.mubr.msk.bf16.vlgmr.msra.gmra.mrb[44].mxu0 %vm441_vm1, %v1903_v20 }
 0x625   : >> { %v1777_v24 = vpop.f32.mrb[44].mxu0 }
 0x626   : >> { %v1320_v5 = vadd.f32 %v1777_v24, %v1254_v4  ;;  %v1311_v26 = vpop.f32.mrb[45].mxu0 }
 0x627   : >> { %v1312_v28 = vadd.f32 %v1311_v26, %v1244_v22  ;;  %v1778_v8 = vpop.f32.mrb[46].mxu0 }
 0x628   : >> { %v1328_v30 = vmax.f32 %v1320_v5, 0.0  ;;  %v1323_v31 = vadd.f32 %v1778_v8, %v1259_v6  ;;  %v1314_v32 = vpop.f32.mrb[47].mxu0 }
 0x629   : >> { %v1326_v33 = vmax.f32 %v1312_v28, 0.0  ;;  %v1315_v35 = vadd.f32 %v1314_v32, %v1249_v23  ;;  %356 = sbr.rel (!%p354_p2) target bundleno = 189 (0xbd), region = 122 }
 0x62a   : >> { %v1332_v56 = vadd.f32 %v1979_v36, %v1328_v30  ;;  %v1329_v50 = vmax.f32 %v1323_v31, 0.0 }
 0x62b   : >> { %v1330_v53 = vadd.f32 %v1980_v37, %v1326_v33  ;;  %v1327_v38 = vmax.f32 %v1315_v35, 0.0 }
 0x62c   : >> { %1336 = vst [vmem:[#allocation2 + $0x10] sm:$0xff] %v1332_v56  ;;  %1341 = vst [vmem:[%s1338_s20 + $0x10] sm:$0xff] %v1332_v56  ;;  %v1333_v41 = vadd.f32 %v1981_v40, %v1329_v50 }
 0x62d   : >> { %1334 = vst [vmem:[#allocation2] sm:$0xff] %v1330_v53  ;;  %1339 = vst [vmem:[%s1338_s20] sm:$0xff] %v1330_v53  ;;  %v1331_v44 = vadd.f32 %v1982_v42, %v1327_v38 }
 0x62e   : >> { %1337 = vst [vmem:[#allocation2 + $0x18] sm:$0xff] %v1333_v41  ;;  %1342 = vst [vmem:[%s1338_s20 + $0x18] sm:$0xff] %v1333_v41 }
 0x62f   : >> { %1335 = vst [vmem:[#allocation2 + $0x8] sm:$0xff] %v1331_v44  ;;  %1340 = vst [vmem:[%s1338_s20 + $0x8] sm:$0xff] %v1331_v44 }
 0x630   : > { %2166 = shalt.err (!%p2163_p6)
}
 0x631   : > { %s2167_s18 = scalar_lea.hbm %s2802_s30, 1024  ;;  %s2171_s16 = scalar_lea.hbm %s2855_s6, 2048 }
 0x632   : > { %p2168_p9 = scmp.ne.s32.totalorder %s2802_s30, %s2167_s18  ;;  %p2172_p0 = scmp.lt.u32.totalorder %s2802_s30, %s2855_s6 }
 0x633   : > { %p2173_p5 = scmp.lt.u32.totalorder %s2171_s16, %s2167_s18  ;;  %p2175_p7 = scmp.lt.u32.totalorder %s2167_s18, %s2802_s30 }
 0x634   : > { %p2169_p4 = pnand %p2168_p9, %p2877_p10 }
 0x635   : > { %p2174_p2 = por %p2173_p5, %p2172_p0 }
 0x636   : > { %p2170_p3 = pneg %p2169_p4 }
 0x637   : > { %p2176_p1 = por %p2175_p7, %p2174_p2 }
 0x639   : > { %p2177_p11 = pnand %p2176_p1, %p2170_p3 }
 0x63b   : > { %2180 = shalt.err (!%p2177_p11)
}
 0x63c   : > { %s2255_s28 = smov 128   ;;  %s2256_s29 = smov 8  }
 0x63d   : > { %1801 = dma.vmem_to_hbm [thread:$0]  (%p2877_p10), %s2805_s8, 1024, %s2802_s30, %s1344_s7, %s2255_s28, %s2255_s28, %s2256_s29  }
 0x63e PF: > { %s1372_s9 = sand.u32 1, %s2223_s21   ;;  %p2878_p12 = scmp.ne.s32.totalorder %s2868_s12, 0 }
 0x63f   : > { %p2879_p13 = scmp.ge.s32.totalorder %s2235_s24, 2  ;;  %s1373_s19 = scalar_lea.sflag [#allocation9], %s1372_s9 }
 0x641   : > { %p1824_p8 = pnand %p2879_p13, %p2878_p12 }
 0x643   : > { %2218 = dma.done.wait (!%p1824_p8), %s1373_s19, 1024  }
 0x644   : > { %2220 = vsyncadd (!%p1824_p8), %s1373_s19, 4294966272  ;;  %p22_p6 = scmp.ge.s32.totalorder %s2461_s15, 4   ;;  %s2880_s21 = smov %s2227_s22 }
 0x645   : > { %s2881_s22 = smov %s2231_s23  ;;  %s2882_s23 = smov %s2473_s25 }
 0x646   : > { %s2883_s24 = smov %s2461_s15  ;;  %24 = sbr.rel (!%p22_p6) target bundleno = 8 (0x8), region = 133 }
 0x64d   :  { %1378 = vsyncpa [#allocation8], 1 }
 0x64e   :  { %1380 = vsyncpa [#allocation8 + $0x1], 1 }
 0x64f   :  { %1381 = vsyncpa [#allocation11], 1 }
 0x650   :  { %1382 = vsyncpa [#allocation14], 1 }
 0x651   :  { %1383 = vsyncpa [#allocation17], 1 }
 0x652   :  { %1384 = vsyncpa [#allocation9], 1 }
 0x653   :  { %1386 = vsyncpa [#allocation9 + $0x1], 1 }

</bundles_post_ra>
